<compile_context>
chip_gen: v7x
topology: tpu7x:2x2x1
jax: 0.10.0
libtpu: 0.0.40
codegen_flags: <defaults>
</compile_context>

<pallas_src>
import math
import functools
import numpy as np
import jax
import jax.numpy as jnp
from jax.experimental import pallas as pl
from jax.experimental.pallas import tpu as pltpu


def mha_kernel(q_ref, k_ref, v_ref, wqkv_ref, bqkv_ref, wl_ref, bl_ref, o_ref,
               *, num_heads):
    Bt, S, D = q_ref.shape
    H = num_heads
    M = Bt * S

    w = wqkv_ref[...]                    # bf16 [D, 3*HD]
    b = bqkv_ref[...]                    # f32  [1, 3*HD]
    wl = wl_ref[...]                     # bf16 [HD, D]
    bl = bl_ref[...]                     # f32  [1, D]
    HD = w.shape[1] // 3                 # H * d_k
    d_k = HD // H

    # Flatten the batch block into the matmul M dimension.
    q = q_ref[...].reshape(M, D)         # bf16 [M, D]
    k = k_ref[...].reshape(M, D)
    v = v_ref[...].reshape(M, D)

    # Fused all-heads projections: bf16 into the MXU, f32 accumulate, f32 bias
    # add.  1/sqrt(d_k) is already folded into the query weight/bias columns.
    qh = jnp.dot(q, w[:, 0 * HD:1 * HD], preferred_element_type=jnp.float32) + b[:, 0 * HD:1 * HD]
    kh = jnp.dot(k, w[:, 1 * HD:2 * HD], preferred_element_type=jnp.float32) + b[:, 1 * HD:2 * HD]
    vh = jnp.dot(v, w[:, 2 * HD:3 * HD], preferred_element_type=jnp.float32) + b[:, 2 * HD:3 * HD]

    # Single hoisted K transpose (instead of one implicit transpose per head),
    # then cast attention operands to bf16 once for the MXU.
    qh = qh.astype(jnp.bfloat16)                       # [M, HD]
    kh_t = jnp.transpose(kh).astype(jnp.bfloat16)      # [HD, M]
    vh = vh.astype(jnp.bfloat16)                       # [M, HD]

    # Per (batch-in-block, head) scaled-dot-product attention, statically
    # unrolled; the output projection is accumulated per head so no
    # concatenate is needed and no per-head partial stays live.
    for bi in range(Bt):
        r0 = bi * S
        acc = jnp.zeros((S, D), jnp.float32) + bl      # start from output bias
        for h in range(H):
            c0 = h * d_k
            qh_h = qh[r0:r0 + S, c0:c0 + d_k]          # [S, d_k]  bf16
            kt_h = kh_t[c0:c0 + d_k, r0:r0 + S]        # [d_k, S]  bf16
            vh_h = vh[r0:r0 + S, c0:c0 + d_k]          # [S, d_k]  bf16

            s = jnp.dot(qh_h, kt_h, preferred_element_type=jnp.float32)   # [S, S]
            s = s - jnp.max(s, axis=-1, keepdims=True)
            p = jnp.exp(s)
            l = jnp.sum(p, axis=-1, keepdims=True)                        # [S, 1]
            pv = jnp.dot(p.astype(jnp.bfloat16), vh_h,
                         preferred_element_type=jnp.float32)              # [S, d_k]
            # Normalize after PV: scales [S, d_k] instead of [S, S]; the
            # approximate reciprocal runs on the EUP (free slot).
            pv = pv * pl.reciprocal(l, approx=True)

            # Accumulate this head's contribution to the output projection.
            acc = acc + jnp.dot(pv.astype(jnp.bfloat16), wl[c0:c0 + d_k, :],
                                preferred_element_type=jnp.float32)
        o_ref[bi] = acc.astype(o_ref.dtype)


def multi_head_attention(q, k, v, wq, bq, wk, bk, wv, bv, wl, bl, *, block_b=None):
    """q/k/v: [B,S,D]; wq/wk/wv: [H,D,d_k]; bq/bk/bv: [H,1,d_k];
       wl: [H,d_k,D]; bl: [1,D]."""
    B, S, D = q.shape
    H, _, d_k = wq.shape
    HD = H * d_k

    if block_b is None:
        # Fold batches to widen the MXU M dimension; keep >= 2 grid steps when
        # B allows so both v7x TensorCores get a "parallel" step, otherwise
        # collapse fully (best for the single-TC v5e/v6e at tiny B).
        block_b = (B // 2) if (B % 2 == 0 and B >= 4) else B
    assert B % block_b == 0
    grid_b = B // block_b

    scale = 1.0 / math.sqrt(d_k)
    # Pack per-head weights into fused [D, H*d_k] matrices (head-major columns)
    # and fold the score scale into the query projection.  Weights go to bf16
    # for the MXU (halves resident VMEM + DMA bytes); biases stay f32.
    wq_f = jnp.transpose(wq, (1, 0, 2)).reshape(D, HD) * scale
    wk_f = jnp.transpose(wk, (1, 0, 2)).reshape(D, HD)
    wv_f = jnp.transpose(wv, (1, 0, 2)).reshape(D, HD)
    w_qkv = jnp.concatenate([wq_f, wk_f, wv_f], axis=-1).astype(jnp.bfloat16)  # [D, 3*HD]
    b_qkv = jnp.concatenate([bq.reshape(1, HD) * scale,
                             bk.reshape(1, HD),
                             bv.reshape(1, HD)], axis=-1).astype(jnp.float32)  # [1, 3*HD]
    wl_f = wl.reshape(HD, D).astype(jnp.bfloat16)                              # [HD, D]
    bl_f = bl.astype(jnp.float32)                                              # [1, D]

    out_dtype = q.dtype
    qb = q.astype(jnp.bfloat16)
    kb = k.astype(jnp.bfloat16)
    vb = v.astype(jnp.bfloat16)

    kernel = functools.partial(mha_kernel, num_heads=H)

    act_spec = pl.BlockSpec((block_b, S, D), lambda bi: (bi, 0, 0))
    const2 = lambda bi: (0, 0)   # weights/biases: same block every step -> stay resident

    return pl.pallas_call(
        kernel,
        out_shape=jax.ShapeDtypeStruct((B, S, D), out_dtype),
        grid_spec=pltpu.PrefetchScalarGridSpec(
            num_scalar_prefetch=0,
            grid=(grid_b,),
            in_specs=[act_spec, act_spec, act_spec,
                      pl.BlockSpec((D, 3 * HD), const2),
                      pl.BlockSpec((1, 3 * HD), const2),
                      pl.BlockSpec((HD, D), const2),
                      pl.BlockSpec((1, D), const2)],
            out_specs=pl.BlockSpec((block_b, S, D), lambda bi: (bi, 0, 0)),
        ),
        compiler_params=pltpu.CompilerParams(
            dimension_semantics=("parallel",),
            vmem_limit_bytes=32 * 1024 * 1024,
        ),
    )(qb, kb, vb, w_qkv, b_qkv, wl_f, bl_f)


def reference_mha(q, k, v, wq, bq, wk, bk, wv, bv, wl, bl):
    """Plain-JAX f32 reference matching the PyTorch module (mask=None, eval)."""
    d_k = wq.shape[-1]
    qh = jnp.einsum('bsd,hdk->bhsk', q, wq) + bq[None]          # [B,H,S,d_k]
    kh = jnp.einsum('bsd,hdk->bhsk', k, wk) + bk[None]
    vh = jnp.einsum('bsd,hdk->bhsk', v, wv) + bv[None]
    scores = jnp.einsum('bhqk,bhsk->bhqs', qh, kh) / math.sqrt(d_k)
    scores = jax.nn.softmax(scores, axis=-1)
    out = jnp.einsum('bhqs,bhsk->bhqk', scores, vh)             # [B,H,S,d_k]
    out = jnp.einsum('bhsk,hkd->bsd', out, wl) + bl[0]          # sum over heads == concat @ Wl
    return out


if __name__ == "__main__":
    B, S, D, H = 4, 8, 32, 4
    d_k = D // H

    key = jax.random.PRNGKey(0)
    ks = jax.random.split(key, 11)
    f32 = jnp.float32

    q = jax.random.normal(ks[0], (B, S, D), dtype=f32)
    k = jax.random.normal(ks[1], (B, S, D), dtype=f32)
    v = jax.random.normal(ks[2], (B, S, D), dtype=f32)

    scale = 1.0 / math.sqrt(D)
    wq = jax.random.uniform(ks[3], (H, D, d_k), dtype=f32, minval=-scale, maxval=scale)
    bq = jax.random.uniform(ks[4], (H, 1, d_k), dtype=f32, minval=-scale, maxval=scale)
    wk = jax.random.uniform(ks[5], (H, D, d_k), dtype=f32, minval=-scale, maxval=scale)
    bk = jax.random.uniform(ks[6], (H, 1, d_k), dtype=f32, minval=-scale, maxval=scale)
    wv = jax.random.uniform(ks[7], (H, D, d_k), dtype=f32, minval=-scale, maxval=scale)
    bv = jax.random.uniform(ks[8], (H, 1, d_k), dtype=f32, minval=-scale, maxval=scale)
    scale_l = 1.0 / math.sqrt(H * d_k)
    wl = jax.random.uniform(ks[9], (H, d_k, D), dtype=f32, minval=-scale_l, maxval=scale_l)
    bl = jax.random.uniform(ks[10], (1, D), dtype=f32, minval=-scale_l, maxval=scale_l)

    out = multi_head_attention(q, k, v, wq, bq, wk, bk, wv, bv, wl, bl)
    out = jax.block_until_ready(out)

    ref = reference_mha(q, k, v, wq, bq, wk, bk, wv, bv, wl, bl)
    # tolerance covers bf16 MXU inputs + the EUP approx-reciprocal normalization
    np.testing.assert_allclose(np.asarray(out), np.asarray(ref), rtol=2e-2, atol=2e-2)

    print("KERNEL_OK")
</pallas_src>

<mosaic_0001>
module attributes {stable_mosaic.version = 11 : i64} {
  func.func @mha_kernel(%arg0: i32, %arg1: memref<2x8x32xbf16, #tpu.memory_space<vmem>>, %arg2: memref<2x8x32xbf16, #tpu.memory_space<vmem>>, %arg3: memref<2x8x32xbf16, #tpu.memory_space<vmem>>, %arg4: memref<32x96xbf16, #tpu.memory_space<vmem>>, %arg5: memref<1x96xf32, #tpu.memory_space<vmem>>, %arg6: memref<32x32xbf16, #tpu.memory_space<vmem>>, %arg7: memref<1x32xf32, #tpu.memory_space<vmem>>, %arg8: memref<2x8x32xf32, #tpu.memory_space<vmem>>) attributes {dimension_semantics = [#tpu.dimension_semantics<parallel>], iteration_bounds = array<i64: 2>, scalar_prefetch = 0 : i64, scratch_operands = 0 : i64, tpu.core_type = #tpu.core_type<tc>, window_params = [{transform_indices = @transform_0, window_bounds = array<i64: 2, 8, 32>}, {transform_indices = @transform_1, window_bounds = array<i64: 2, 8, 32>}, {transform_indices = @transform_2, window_bounds = array<i64: 2, 8, 32>}, {pipeline_mode = #tpu.pipeline_mode<synchronous>, transform_indices = @transform_3, window_bounds = array<i64: 32, 96>}, {pipeline_mode = #tpu.pipeline_mode<synchronous>, transform_indices = @transform_4, window_bounds = array<i64: 1, 96>}, {pipeline_mode = #tpu.pipeline_mode<synchronous>, transform_indices = @transform_5, window_bounds = array<i64: 32, 32>}, {pipeline_mode = #tpu.pipeline_mode<synchronous>, transform_indices = @transform_6, window_bounds = array<i64: 1, 32>}, {transform_indices = @transform_7, window_bounds = array<i64: 2, 8, 32>}]} {
    %c0 = arith.constant 0 : index
    %c0_0 = arith.constant 0 : index
    %0 = vector.load %arg4[%c0, %c0_0] : memref<32x96xbf16, #tpu.memory_space<vmem>>, vector<32x96xbf16>
    %c0_1 = arith.constant 0 : index
    %c0_2 = arith.constant 0 : index
    %1 = vector.load %arg5[%c0_1, %c0_2] : memref<1x96xf32, #tpu.memory_space<vmem>>, vector<1x96xf32>
    %c0_3 = arith.constant 0 : index
    %c0_4 = arith.constant 0 : index
    %2 = vector.load %arg6[%c0_3, %c0_4] : memref<32x32xbf16, #tpu.memory_space<vmem>>, vector<32x32xbf16>
    %c0_5 = arith.constant 0 : index
    %c0_6 = arith.constant 0 : index
    %3 = vector.load %arg7[%c0_5, %c0_6] : memref<1x32xf32, #tpu.memory_space<vmem>>, vector<1x32xf32>
    %c0_7 = arith.constant 0 : index
    %c0_8 = arith.constant 0 : index
    %c0_9 = arith.constant 0 : index
    %4 = vector.load %arg1[%c0_7, %c0_8, %c0_9] : memref<2x8x32xbf16, #tpu.memory_space<vmem>>, vector<2x8x32xbf16>
    %5 = vector.shape_cast %4 : vector<2x8x32xbf16> to vector<16x32xbf16>
    %c0_10 = arith.constant 0 : index
    %c0_11 = arith.constant 0 : index
    %c0_12 = arith.constant 0 : index
    %6 = vector.load %arg2[%c0_10, %c0_11, %c0_12] : memref<2x8x32xbf16, #tpu.memory_space<vmem>>, vector<2x8x32xbf16>
    %7 = vector.shape_cast %6 : vector<2x8x32xbf16> to vector<16x32xbf16>
    %c0_13 = arith.constant 0 : index
    %c0_14 = arith.constant 0 : index
    %c0_15 = arith.constant 0 : index
    %8 = vector.load %arg3[%c0_13, %c0_14, %c0_15] : memref<2x8x32xbf16, #tpu.memory_space<vmem>>, vector<2x8x32xbf16>
    %9 = vector.shape_cast %8 : vector<2x8x32xbf16> to vector<16x32xbf16>
    %10 = vector.extract_strided_slice %0 {offsets = [0, 0], sizes = [32, 32], strides = [1, 1]} : vector<32x96xbf16> to vector<32x32xbf16>
    %cst = arith.constant dense<0.000000e+00> : vector<16x32xf32>
    %11 = tpu.matmul %5, %10, %cst {dimension_numbers = #tpu.dot_dimension_numbers<[1], [0], [0], [1], [0, 0, 1, 1], [], []>} : vector<16x32xbf16>, vector<32x32xbf16>, vector<16x32xf32> -> vector<16x32xf32>
    %12 = vector.extract_strided_slice %1 {offsets = [0, 0], sizes = [1, 32], strides = [1, 1]} : vector<1x96xf32> to vector<1x32xf32>
    %13 = vector.broadcast %12 : vector<1x32xf32> to vector<16x32xf32>
    %14 = arith.addf %11, %13 : vector<16x32xf32>
    %15 = vector.extract_strided_slice %0 {offsets = [0, 32], sizes = [32, 32], strides = [1, 1]} : vector<32x96xbf16> to vector<32x32xbf16>
    %cst_16 = arith.constant dense<0.000000e+00> : vector<16x32xf32>
    %16 = tpu.matmul %7, %15, %cst_16 {dimension_numbers = #tpu.dot_dimension_numbers<[1], [0], [0], [1], [0, 0, 1, 1], [], []>} : vector<16x32xbf16>, vector<32x32xbf16>, vector<16x32xf32> -> vector<16x32xf32>
    %17 = vector.extract_strided_slice %1 {offsets = [0, 32], sizes = [1, 32], strides = [1, 1]} : vector<1x96xf32> to vector<1x32xf32>
    %18 = vector.broadcast %17 : vector<1x32xf32> to vector<16x32xf32>
    %19 = arith.addf %16, %18 : vector<16x32xf32>
    %20 = vector.extract_strided_slice %0 {offsets = [0, 64], sizes = [32, 32], strides = [1, 1]} : vector<32x96xbf16> to vector<32x32xbf16>
    %cst_17 = arith.constant dense<0.000000e+00> : vector<16x32xf32>
    %21 = tpu.matmul %9, %20, %cst_17 {dimension_numbers = #tpu.dot_dimension_numbers<[1], [0], [0], [1], [0, 0, 1, 1], [], []>} : vector<16x32xbf16>, vector<32x32xbf16>, vector<16x32xf32> -> vector<16x32xf32>
    %22 = vector.extract_strided_slice %1 {offsets = [0, 64], sizes = [1, 32], strides = [1, 1]} : vector<1x96xf32> to vector<1x32xf32>
    %23 = vector.broadcast %22 : vector<1x32xf32> to vector<16x32xf32>
    %24 = arith.addf %21, %23 : vector<16x32xf32>
    %25 = arith.truncf %14 : vector<16x32xf32> to vector<16x32xbf16>
    %26 = tpu.transpose %19, [1, 0] : vector<16x32xf32> -> vector<32x16xf32>
    %27 = arith.truncf %26 : vector<32x16xf32> to vector<32x16xbf16>
    %28 = arith.truncf %24 : vector<16x32xf32> to vector<16x32xbf16>
    %cst_18 = arith.constant 0.000000e+00 : f32
    %29 = vector.broadcast %cst_18 : f32 to vector<8x32xf32>
    %30 = vector.broadcast %3 : vector<1x32xf32> to vector<8x32xf32>
    %31 = arith.addf %29, %30 : vector<8x32xf32>
    %32 = vector.extract_strided_slice %25 {offsets = [0, 0], sizes = [8, 8], strides = [1, 1]} : vector<16x32xbf16> to vector<8x8xbf16>
    %33 = vector.extract_strided_slice %27 {offsets = [0, 0], sizes = [8, 8], strides = [1, 1]} : vector<32x16xbf16> to vector<8x8xbf16>
    %34 = vector.extract_strided_slice %28 {offsets = [0, 0], sizes = [8, 8], strides = [1, 1]} : vector<16x32xbf16> to vector<8x8xbf16>
    %cst_19 = arith.constant dense<0.000000e+00> : vector<8x8xf32>
    %35 = tpu.matmul %32, %33, %cst_19 {dimension_numbers = #tpu.dot_dimension_numbers<[1], [0], [0], [1], [0, 0, 1, 1], [], []>} : vector<8x8xbf16>, vector<8x8xbf16>, vector<8x8xf32> -> vector<8x8xf32>
    %cst_20 = arith.constant dense<0xFF800000> : vector<8xf32>
    %36 = vector.multi_reduction <maximumf>, %35, %cst_20 [1] : vector<8x8xf32> to vector<8xf32>
    %37 = vector.shape_cast %36 : vector<8xf32> to vector<8x1xf32>
    %38 = vector.broadcast %37 : vector<8x1xf32> to vector<8x8xf32>
    %39 = arith.subf %35, %38 : vector<8x8xf32>
    %40 = math.exp %39 : vector<8x8xf32>
    %cst_21 = arith.constant dense<0.000000e+00> : vector<8xf32>
    %41 = vector.multi_reduction <add>, %40, %cst_21 [1] : vector<8x8xf32> to vector<8xf32>
    %42 = vector.shape_cast %41 : vector<8xf32> to vector<8x1xf32>
    %43 = arith.truncf %40 : vector<8x8xf32> to vector<8x8xbf16>
    %cst_22 = arith.constant dense<0.000000e+00> : vector<8x8xf32>
    %44 = tpu.matmul %43, %34, %cst_22 {dimension_numbers = #tpu.dot_dimension_numbers<[1], [0], [0], [1], [0, 0, 1, 1], [], []>} : vector<8x8xbf16>, vector<8x8xbf16>, vector<8x8xf32> -> vector<8x8xf32>
    %45 = tpu.reciprocal %42 {approx = true} : vector<8x1xf32> -> vector<8x1xf32>
    %46 = vector.broadcast %45 : vector<8x1xf32> to vector<8x8xf32>
    %47 = arith.mulf %44, %46 : vector<8x8xf32>
    %48 = arith.truncf %47 : vector<8x8xf32> to vector<8x8xbf16>
    %49 = vector.extract_strided_slice %2 {offsets = [0, 0], sizes = [8, 32], strides = [1, 1]} : vector<32x32xbf16> to vector<8x32xbf16>
    %cst_23 = arith.constant dense<0.000000e+00> : vector<8x32xf32>
    %50 = tpu.matmul %48, %49, %cst_23 {dimension_numbers = #tpu.dot_dimension_numbers<[1], [0], [0], [1], [0, 0, 1, 1], [], []>} : vector<8x8xbf16>, vector<8x32xbf16>, vector<8x32xf32> -> vector<8x32xf32>
    %51 = arith.addf %31, %50 : vector<8x32xf32>
    %52 = vector.extract_strided_slice %25 {offsets = [0, 8], sizes = [8, 8], strides = [1, 1]} : vector<16x32xbf16> to vector<8x8xbf16>
    %53 = vector.extract_strided_slice %27 {offsets = [8, 0], sizes = [8, 8], strides = [1, 1]} : vector<32x16xbf16> to vector<8x8xbf16>
    %54 = vector.extract_strided_slice %28 {offsets = [0, 8], sizes = [8, 8], strides = [1, 1]} : vector<16x32xbf16> to vector<8x8xbf16>
    %cst_24 = arith.constant dense<0.000000e+00> : vector<8x8xf32>
    %55 = tpu.matmul %52, %53, %cst_24 {dimension_numbers = #tpu.dot_dimension_numbers<[1], [0], [0], [1], [0, 0, 1, 1], [], []>} : vector<8x8xbf16>, vector<8x8xbf16>, vector<8x8xf32> -> vector<8x8xf32>
    %cst_25 = arith.constant dense<0xFF800000> : vector<8xf32>
    %56 = vector.multi_reduction <maximumf>, %55, %cst_25 [1] : vector<8x8xf32> to vector<8xf32>
    %57 = vector.shape_cast %56 : vector<8xf32> to vector<8x1xf32>
    %58 = vector.broadcast %57 : vector<8x1xf32> to vector<8x8xf32>
    %59 = arith.subf %55, %58 : vector<8x8xf32>
    %60 = math.exp %59 : vector<8x8xf32>
    %cst_26 = arith.constant dense<0.000000e+00> : vector<8xf32>
    %61 = vector.multi_reduction <add>, %60, %cst_26 [1] : vector<8x8xf32> to vector<8xf32>
    %62 = vector.shape_cast %61 : vector<8xf32> to vector<8x1xf32>
    %63 = arith.truncf %60 : vector<8x8xf32> to vector<8x8xbf16>
    %cst_27 = arith.constant dense<0.000000e+00> : vector<8x8xf32>
    %64 = tpu.matmul %63, %54, %cst_27 {dimension_numbers = #tpu.dot_dimension_numbers<[1], [0], [0], [1], [0, 0, 1, 1], [], []>} : vector<8x8xbf16>, vector<8x8xbf16>, vector<8x8xf32> -> vector<8x8xf32>
    %65 = tpu.reciprocal %62 {approx = true} : vector<8x1xf32> -> vector<8x1xf32>
    %66 = vector.broadcast %65 : vector<8x1xf32> to vector<8x8xf32>
    %67 = arith.mulf %64, %66 : vector<8x8xf32>
    %68 = arith.truncf %67 : vector<8x8xf32> to vector<8x8xbf16>
    %69 = vector.extract_strided_slice %2 {offsets = [8, 0], sizes = [8, 32], strides = [1, 1]} : vector<32x32xbf16> to vector<8x32xbf16>
    %cst_28 = arith.constant dense<0.000000e+00> : vector<8x32xf32>
    %70 = tpu.matmul %68, %69, %cst_28 {dimension_numbers = #tpu.dot_dimension_numbers<[1], [0], [0], [1], [0, 0, 1, 1], [], []>} : vector<8x8xbf16>, vector<8x32xbf16>, vector<8x32xf32> -> vector<8x32xf32>
    %71 = arith.addf %51, %70 : vector<8x32xf32>
    %72 = vector.extract_strided_slice %25 {offsets = [0, 16], sizes = [8, 8], strides = [1, 1]} : vector<16x32xbf16> to vector<8x8xbf16>
    %73 = vector.extract_strided_slice %27 {offsets = [16, 0], sizes = [8, 8], strides = [1, 1]} : vector<32x16xbf16> to vector<8x8xbf16>
    %74 = vector.extract_strided_slice %28 {offsets = [0, 16], sizes = [8, 8], strides = [1, 1]} : vector<16x32xbf16> to vector<8x8xbf16>
    %cst_29 = arith.constant dense<0.000000e+00> : vector<8x8xf32>
    %75 = tpu.matmul %72, %73, %cst_29 {dimension_numbers = #tpu.dot_dimension_numbers<[1], [0], [0], [1], [0, 0, 1, 1], [], []>} : vector<8x8xbf16>, vector<8x8xbf16>, vector<8x8xf32> -> vector<8x8xf32>
    %cst_30 = arith.constant dense<0xFF800000> : vector<8xf32>
    %76 = vector.multi_reduction <maximumf>, %75, %cst_30 [1] : vector<8x8xf32> to vector<8xf32>
    %77 = vector.shape_cast %76 : vector<8xf32> to vector<8x1xf32>
    %78 = vector.broadcast %77 : vector<8x1xf32> to vector<8x8xf32>
    %79 = arith.subf %75, %78 : vector<8x8xf32>
    %80 = math.exp %79 : vector<8x8xf32>
    %cst_31 = arith.constant dense<0.000000e+00> : vector<8xf32>
    %81 = vector.multi_reduction <add>, %80, %cst_31 [1] : vector<8x8xf32> to vector<8xf32>
    %82 = vector.shape_cast %81 : vector<8xf32> to vector<8x1xf32>
    %83 = arith.truncf %80 : vector<8x8xf32> to vector<8x8xbf16>
    %cst_32 = arith.constant dense<0.000000e+00> : vector<8x8xf32>
    %84 = tpu.matmul %83, %74, %cst_32 {dimension_numbers = #tpu.dot_dimension_numbers<[1], [0], [0], [1], [0, 0, 1, 1], [], []>} : vector<8x8xbf16>, vector<8x8xbf16>, vector<8x8xf32> -> vector<8x8xf32>
    %85 = tpu.reciprocal %82 {approx = true} : vector<8x1xf32> -> vector<8x1xf32>
    %86 = vector.broadcast %85 : vector<8x1xf32> to vector<8x8xf32>
    %87 = arith.mulf %84, %86 : vector<8x8xf32>
    %88 = arith.truncf %87 : vector<8x8xf32> to vector<8x8xbf16>
    %89 = vector.extract_strided_slice %2 {offsets = [16, 0], sizes = [8, 32], strides = [1, 1]} : vector<32x32xbf16> to vector<8x32xbf16>
    %cst_33 = arith.constant dense<0.000000e+00> : vector<8x32xf32>
    %90 = tpu.matmul %88, %89, %cst_33 {dimension_numbers = #tpu.dot_dimension_numbers<[1], [0], [0], [1], [0, 0, 1, 1], [], []>} : vector<8x8xbf16>, vector<8x32xbf16>, vector<8x32xf32> -> vector<8x32xf32>
    %91 = arith.addf %71, %90 : vector<8x32xf32>
    %92 = vector.extract_strided_slice %25 {offsets = [0, 24], sizes = [8, 8], strides = [1, 1]} : vector<16x32xbf16> to vector<8x8xbf16>
    %93 = vector.extract_strided_slice %27 {offsets = [24, 0], sizes = [8, 8], strides = [1, 1]} : vector<32x16xbf16> to vector<8x8xbf16>
    %94 = vector.extract_strided_slice %28 {offsets = [0, 24], sizes = [8, 8], strides = [1, 1]} : vector<16x32xbf16> to vector<8x8xbf16>
    %cst_34 = arith.constant dense<0.000000e+00> : vector<8x8xf32>
    %95 = tpu.matmul %92, %93, %cst_34 {dimension_numbers = #tpu.dot_dimension_numbers<[1], [0], [0], [1], [0, 0, 1, 1], [], []>} : vector<8x8xbf16>, vector<8x8xbf16>, vector<8x8xf32> -> vector<8x8xf32>
    %cst_35 = arith.constant dense<0xFF800000> : vector<8xf32>
    %96 = vector.multi_reduction <maximumf>, %95, %cst_35 [1] : vector<8x8xf32> to vector<8xf32>
    %97 = vector.shape_cast %96 : vector<8xf32> to vector<8x1xf32>
    %98 = vector.broadcast %97 : vector<8x1xf32> to vector<8x8xf32>
    %99 = arith.subf %95, %98 : vector<8x8xf32>
    %100 = math.exp %99 : vector<8x8xf32>
    %cst_36 = arith.constant dense<0.000000e+00> : vector<8xf32>
    %101 = vector.multi_reduction <add>, %100, %cst_36 [1] : vector<8x8xf32> to vector<8xf32>
    %102 = vector.shape_cast %101 : vector<8xf32> to vector<8x1xf32>
    %103 = arith.truncf %100 : vector<8x8xf32> to vector<8x8xbf16>
    %cst_37 = arith.constant dense<0.000000e+00> : vector<8x8xf32>
    %104 = tpu.matmul %103, %94, %cst_37 {dimension_numbers = #tpu.dot_dimension_numbers<[1], [0], [0], [1], [0, 0, 1, 1], [], []>} : vector<8x8xbf16>, vector<8x8xbf16>, vector<8x8xf32> -> vector<8x8xf32>
    %105 = tpu.reciprocal %102 {approx = true} : vector<8x1xf32> -> vector<8x1xf32>
    %106 = vector.broadcast %105 : vector<8x1xf32> to vector<8x8xf32>
    %107 = arith.mulf %104, %106 : vector<8x8xf32>
    %108 = arith.truncf %107 : vector<8x8xf32> to vector<8x8xbf16>
    %109 = vector.extract_strided_slice %2 {offsets = [24, 0], sizes = [8, 32], strides = [1, 1]} : vector<32x32xbf16> to vector<8x32xbf16>
    %cst_38 = arith.constant dense<0.000000e+00> : vector<8x32xf32>
    %110 = tpu.matmul %108, %109, %cst_38 {dimension_numbers = #tpu.dot_dimension_numbers<[1], [0], [0], [1], [0, 0, 1, 1], [], []>} : vector<8x8xbf16>, vector<8x32xbf16>, vector<8x32xf32> -> vector<8x32xf32>
    %111 = arith.addf %91, %110 : vector<8x32xf32>
    %c0_39 = arith.constant 0 : index
    %c0_40 = arith.constant 0 : index
    %c0_41 = arith.constant 0 : index
    %112 = vector.load %arg8[%c0_39, %c0_40, %c0_41] : memref<2x8x32xf32, #tpu.memory_space<vmem>>, vector<1x8x32xf32>
    %113 = vector.shape_cast %112 : vector<1x8x32xf32> to vector<8x32xf32>
    %114 = vector.shape_cast %111 : vector<8x32xf32> to vector<1x8x32xf32>
    tpu.vector_store %arg8[%c0_39, %c0_40, %c0_41], %114 {strides = array<i32>} : memref<2x8x32xf32, #tpu.memory_space<vmem>>, vector<1x8x32xf32>,
    %cst_42 = arith.constant 0.000000e+00 : f32
    %115 = vector.broadcast %cst_42 : f32 to vector<8x32xf32>
    %116 = vector.broadcast %3 : vector<1x32xf32> to vector<8x32xf32>
    %117 = arith.addf %115, %116 : vector<8x32xf32>
    %118 = vector.extract_strided_slice %25 {offsets = [8, 0], sizes = [8, 8], strides = [1, 1]} : vector<16x32xbf16> to vector<8x8xbf16>
    %119 = vector.extract_strided_slice %27 {offsets = [0, 8], sizes = [8, 8], strides = [1, 1]} : vector<32x16xbf16> to vector<8x8xbf16>
    %120 = vector.extract_strided_slice %28 {offsets = [8, 0], sizes = [8, 8], strides = [1, 1]} : vector<16x32xbf16> to vector<8x8xbf16>
    %cst_43 = arith.constant dense<0.000000e+00> : vector<8x8xf32>
    %121 = tpu.matmul %118, %119, %cst_43 {dimension_numbers = #tpu.dot_dimension_numbers<[1], [0], [0], [1], [0, 0, 1, 1], [], []>} : vector<8x8xbf16>, vector<8x8xbf16>, vector<8x8xf32> -> vector<8x8xf32>
    %cst_44 = arith.constant dense<0xFF800000> : vector<8xf32>
    %122 = vector.multi_reduction <maximumf>, %121, %cst_44 [1] : vector<8x8xf32> to vector<8xf32>
    %123 = vector.shape_cast %122 : vector<8xf32> to vector<8x1xf32>
    %124 = vector.broadcast %123 : vector<8x1xf32> to vector<8x8xf32>
    %125 = arith.subf %121, %124 : vector<8x8xf32>
    %126 = math.exp %125 : vector<8x8xf32>
    %cst_45 = arith.constant dense<0.000000e+00> : vector<8xf32>
    %127 = vector.multi_reduction <add>, %126, %cst_45 [1] : vector<8x8xf32> to vector<8xf32>
    %128 = vector.shape_cast %127 : vector<8xf32> to vector<8x1xf32>
    %129 = arith.truncf %126 : vector<8x8xf32> to vector<8x8xbf16>
    %cst_46 = arith.constant dense<0.000000e+00> : vector<8x8xf32>
    %130 = tpu.matmul %129, %120, %cst_46 {dimension_numbers = #tpu.dot_dimension_numbers<[1], [0], [0], [1], [0, 0, 1, 1], [], []>} : vector<8x8xbf16>, vector<8x8xbf16>, vector<8x8xf32> -> vector<8x8xf32>
    %131 = tpu.reciprocal %128 {approx = true} : vector<8x1xf32> -> vector<8x1xf32>
    %132 = vector.broadcast %131 : vector<8x1xf32> to vector<8x8xf32>
    %133 = arith.mulf %130, %132 : vector<8x8xf32>
    %134 = arith.truncf %133 : vector<8x8xf32> to vector<8x8xbf16>
    %135 = vector.extract_strided_slice %2 {offsets = [0, 0], sizes = [8, 32], strides = [1, 1]} : vector<32x32xbf16> to vector<8x32xbf16>
    %cst_47 = arith.constant dense<0.000000e+00> : vector<8x32xf32>
    %136 = tpu.matmul %134, %135, %cst_47 {dimension_numbers = #tpu.dot_dimension_numbers<[1], [0], [0], [1], [0, 0, 1, 1], [], []>} : vector<8x8xbf16>, vector<8x32xbf16>, vector<8x32xf32> -> vector<8x32xf32>
    %137 = arith.addf %117, %136 : vector<8x32xf32>
    %138 = vector.extract_strided_slice %25 {offsets = [8, 8], sizes = [8, 8], strides = [1, 1]} : vector<16x32xbf16> to vector<8x8xbf16>
    %139 = vector.extract_strided_slice %27 {offsets = [8, 8], sizes = [8, 8], strides = [1, 1]} : vector<32x16xbf16> to vector<8x8xbf16>
    %140 = vector.extract_strided_slice %28 {offsets = [8, 8], sizes = [8, 8], strides = [1, 1]} : vector<16x32xbf16> to vector<8x8xbf16>
    %cst_48 = arith.constant dense<0.000000e+00> : vector<8x8xf32>
    %141 = tpu.matmul %138, %139, %cst_48 {dimension_numbers = #tpu.dot_dimension_numbers<[1], [0], [0], [1], [0, 0, 1, 1], [], []>} : vector<8x8xbf16>, vector<8x8xbf16>, vector<8x8xf32> -> vector<8x8xf32>
    %cst_49 = arith.constant dense<0xFF800000> : vector<8xf32>
    %142 = vector.multi_reduction <maximumf>, %141, %cst_49 [1] : vector<8x8xf32> to vector<8xf32>
    %143 = vector.shape_cast %142 : vector<8xf32> to vector<8x1xf32>
    %144 = vector.broadcast %143 : vector<8x1xf32> to vector<8x8xf32>
    %145 = arith.subf %141, %144 : vector<8x8xf32>
    %146 = math.exp %145 : vector<8x8xf32>
    %cst_50 = arith.constant dense<0.000000e+00> : vector<8xf32>
    %147 = vector.multi_reduction <add>, %146, %cst_50 [1] : vector<8x8xf32> to vector<8xf32>
    %148 = vector.shape_cast %147 : vector<8xf32> to vector<8x1xf32>
    %149 = arith.truncf %146 : vector<8x8xf32> to vector<8x8xbf16>
    %cst_51 = arith.constant dense<0.000000e+00> : vector<8x8xf32>
    %150 = tpu.matmul %149, %140, %cst_51 {dimension_numbers = #tpu.dot_dimension_numbers<[1], [0], [0], [1], [0, 0, 1, 1], [], []>} : vector<8x8xbf16>, vector<8x8xbf16>, vector<8x8xf32> -> vector<8x8xf32>
    %151 = tpu.reciprocal %148 {approx = true} : vector<8x1xf32> -> vector<8x1xf32>
    %152 = vector.broadcast %151 : vector<8x1xf32> to vector<8x8xf32>
    %153 = arith.mulf %150, %152 : vector<8x8xf32>
    %154 = arith.truncf %153 : vector<8x8xf32> to vector<8x8xbf16>
    %155 = vector.extract_strided_slice %2 {offsets = [8, 0], sizes = [8, 32], strides = [1, 1]} : vector<32x32xbf16> to vector<8x32xbf16>
    %cst_52 = arith.constant dense<0.000000e+00> : vector<8x32xf32>
    %156 = tpu.matmul %154, %155, %cst_52 {dimension_numbers = #tpu.dot_dimension_numbers<[1], [0], [0], [1], [0, 0, 1, 1], [], []>} : vector<8x8xbf16>, vector<8x32xbf16>, vector<8x32xf32> -> vector<8x32xf32>
    %157 = arith.addf %137, %156 : vector<8x32xf32>
    %158 = vector.extract_strided_slice %25 {offsets = [8, 16], sizes = [8, 8], strides = [1, 1]} : vector<16x32xbf16> to vector<8x8xbf16>
    %159 = vector.extract_strided_slice %27 {offsets = [16, 8], sizes = [8, 8], strides = [1, 1]} : vector<32x16xbf16> to vector<8x8xbf16>
    %160 = vector.extract_strided_slice %28 {offsets = [8, 16], sizes = [8, 8], strides = [1, 1]} : vector<16x32xbf16> to vector<8x8xbf16>
    %cst_53 = arith.constant dense<0.000000e+00> : vector<8x8xf32>
    %161 = tpu.matmul %158, %159, %cst_53 {dimension_numbers = #tpu.dot_dimension_numbers<[1], [0], [0], [1], [0, 0, 1, 1], [], []>} : vector<8x8xbf16>, vector<8x8xbf16>, vector<8x8xf32> -> vector<8x8xf32>
    %cst_54 = arith.constant dense<0xFF800000> : vector<8xf32>
    %162 = vector.multi_reduction <maximumf>, %161, %cst_54 [1] : vector<8x8xf32> to vector<8xf32>
    %163 = vector.shape_cast %162 : vector<8xf32> to vector<8x1xf32>
    %164 = vector.broadcast %163 : vector<8x1xf32> to vector<8x8xf32>
    %165 = arith.subf %161, %164 : vector<8x8xf32>
    %166 = math.exp %165 : vector<8x8xf32>
    %cst_55 = arith.constant dense<0.000000e+00> : vector<8xf32>
    %167 = vector.multi_reduction <add>, %166, %cst_55 [1] : vector<8x8xf32> to vector<8xf32>
    %168 = vector.shape_cast %167 : vector<8xf32> to vector<8x1xf32>
    %169 = arith.truncf %166 : vector<8x8xf32> to vector<8x8xbf16>
    %cst_56 = arith.constant dense<0.000000e+00> : vector<8x8xf32>
    %170 = tpu.matmul %169, %160, %cst_56 {dimension_numbers = #tpu.dot_dimension_numbers<[1], [0], [0], [1], [0, 0, 1, 1], [], []>} : vector<8x8xbf16>, vector<8x8xbf16>, vector<8x8xf32> -> vector<8x8xf32>
    %171 = tpu.reciprocal %168 {approx = true} : vector<8x1xf32> -> vector<8x1xf32>
    %172 = vector.broadcast %171 : vector<8x1xf32> to vector<8x8xf32>
    %173 = arith.mulf %170, %172 : vector<8x8xf32>
    %174 = arith.truncf %173 : vector<8x8xf32> to vector<8x8xbf16>
    %175 = vector.extract_strided_slice %2 {offsets = [16, 0], sizes = [8, 32], strides = [1, 1]} : vector<32x32xbf16> to vector<8x32xbf16>
    %cst_57 = arith.constant dense<0.000000e+00> : vector<8x32xf32>
    %176 = tpu.matmul %174, %175, %cst_57 {dimension_numbers = #tpu.dot_dimension_numbers<[1], [0], [0], [1], [0, 0, 1, 1], [], []>} : vector<8x8xbf16>, vector<8x32xbf16>, vector<8x32xf32> -> vector<8x32xf32>
    %177 = arith.addf %157, %176 : vector<8x32xf32>
    %178 = vector.extract_strided_slice %25 {offsets = [8, 24], sizes = [8, 8], strides = [1, 1]} : vector<16x32xbf16> to vector<8x8xbf16>
    %179 = vector.extract_strided_slice %27 {offsets = [24, 8], sizes = [8, 8], strides = [1, 1]} : vector<32x16xbf16> to vector<8x8xbf16>
    %180 = vector.extract_strided_slice %28 {offsets = [8, 24], sizes = [8, 8], strides = [1, 1]} : vector<16x32xbf16> to vector<8x8xbf16>
    %cst_58 = arith.constant dense<0.000000e+00> : vector<8x8xf32>
    %181 = tpu.matmul %178, %179, %cst_58 {dimension_numbers = #tpu.dot_dimension_numbers<[1], [0], [0], [1], [0, 0, 1, 1], [], []>} : vector<8x8xbf16>, vector<8x8xbf16>, vector<8x8xf32> -> vector<8x8xf32>
    %cst_59 = arith.constant dense<0xFF800000> : vector<8xf32>
    %182 = vector.multi_reduction <maximumf>, %181, %cst_59 [1] : vector<8x8xf32> to vector<8xf32>
    %183 = vector.shape_cast %182 : vector<8xf32> to vector<8x1xf32>
    %184 = vector.broadcast %183 : vector<8x1xf32> to vector<8x8xf32>
    %185 = arith.subf %181, %184 : vector<8x8xf32>
    %186 = math.exp %185 : vector<8x8xf32>
    %cst_60 = arith.constant dense<0.000000e+00> : vector<8xf32>
    %187 = vector.multi_reduction <add>, %186, %cst_60 [1] : vector<8x8xf32> to vector<8xf32>
    %188 = vector.shape_cast %187 : vector<8xf32> to vector<8x1xf32>
    %189 = arith.truncf %186 : vector<8x8xf32> to vector<8x8xbf16>
    %cst_61 = arith.constant dense<0.000000e+00> : vector<8x8xf32>
    %190 = tpu.matmul %189, %180, %cst_61 {dimension_numbers = #tpu.dot_dimension_numbers<[1], [0], [0], [1], [0, 0, 1, 1], [], []>} : vector<8x8xbf16>, vector<8x8xbf16>, vector<8x8xf32> -> vector<8x8xf32>
    %191 = tpu.reciprocal %188 {approx = true} : vector<8x1xf32> -> vector<8x1xf32>
    %192 = vector.broadcast %191 : vector<8x1xf32> to vector<8x8xf32>
    %193 = arith.mulf %190, %192 : vector<8x8xf32>
    %194 = arith.truncf %193 : vector<8x8xf32> to vector<8x8xbf16>
    %195 = vector.extract_strided_slice %2 {offsets = [24, 0], sizes = [8, 32], strides = [1, 1]} : vector<32x32xbf16> to vector<8x32xbf16>
    %cst_62 = arith.constant dense<0.000000e+00> : vector<8x32xf32>
    %196 = tpu.matmul %194, %195, %cst_62 {dimension_numbers = #tpu.dot_dimension_numbers<[1], [0], [0], [1], [0, 0, 1, 1], [], []>} : vector<8x8xbf16>, vector<8x32xbf16>, vector<8x32xf32> -> vector<8x32xf32>
    %197 = arith.addf %177, %196 : vector<8x32xf32>
    %c1 = arith.constant 1 : index
    %c0_63 = arith.constant 0 : index
    %c0_64 = arith.constant 0 : index
    %198 = vector.load %arg8[%c1, %c0_63, %c0_64] : memref<2x8x32xf32, #tpu.memory_space<vmem>>, vector<1x8x32xf32>
    %199 = vector.shape_cast %198 : vector<1x8x32xf32> to vector<8x32xf32>
    %200 = vector.shape_cast %197 : vector<8x32xf32> to vector<1x8x32xf32>
    tpu.vector_store %arg8[%c1, %c0_63, %c0_64], %200 {strides = array<i32>} : memref<2x8x32xf32, #tpu.memory_space<vmem>>, vector<1x8x32xf32>,
    return
  }
  func.func @transform_0(%arg0: i32) -> (i32, i32, i32) {
    %c0_i32 = arith.constant 0 : i32
    %c0_i32_0 = arith.constant 0 : i32
    %c0_i32_1 = arith.constant 0 : i32
    return %arg0, %c0_i32, %c0_i32_0 : i32, i32, i32
  }
  func.func @transform_1(%arg0: i32) -> (i32, i32, i32) {
    %c0_i32 = arith.constant 0 : i32
    %c0_i32_0 = arith.constant 0 : i32
    %c0_i32_1 = arith.constant 0 : i32
    return %arg0, %c0_i32, %c0_i32_0 : i32, i32, i32
  }
  func.func @transform_2(%arg0: i32) -> (i32, i32, i32) {
    %c0_i32 = arith.constant 0 : i32
    %c0_i32_0 = arith.constant 0 : i32
    %c0_i32_1 = arith.constant 0 : i32
    return %arg0, %c0_i32, %c0_i32_0 : i32, i32, i32
  }
  func.func @transform_3(%arg0: i32) -> (i32, i32) {
    %c0_i32 = arith.constant 0 : i32
    %c0_i32_0 = arith.constant 0 : i32
    %c0_i32_1 = arith.constant 0 : i32
    return %c0_i32, %c0_i32_0 : i32, i32
  }
  func.func @transform_4(%arg0: i32) -> (i32, i32) {
    %c0_i32 = arith.constant 0 : i32
    %c0_i32_0 = arith.constant 0 : i32
    %c0_i32_1 = arith.constant 0 : i32
    return %c0_i32, %c0_i32_0 : i32, i32
  }
  func.func @transform_5(%arg0: i32) -> (i32, i32) {
    %c0_i32 = arith.constant 0 : i32
    %c0_i32_0 = arith.constant 0 : i32
    %c0_i32_1 = arith.constant 0 : i32
    return %c0_i32, %c0_i32_0 : i32, i32
  }
  func.func @transform_6(%arg0: i32) -> (i32, i32) {
    %c0_i32 = arith.constant 0 : i32
    %c0_i32_0 = arith.constant 0 : i32
    %c0_i32_1 = arith.constant 0 : i32
    return %c0_i32, %c0_i32_0 : i32, i32
  }
  func.func @transform_7(%arg0: i32) -> (i32, i32, i32) {
    %c0_i32 = arith.constant 0 : i32
    %c0_i32_0 = arith.constant 0 : i32
    %c0_i32_1 = arith.constant 0 : i32
    return %arg0, %c0_i32, %c0_i32_0 : i32, i32, i32
  }
}

</mosaic_0001>

<bundles_post_ra>
// kernel: tpu_custom_call.1
= control target key start
LH: loop header
LB: loop body
LE: loop exit
PB: predicated region body
PF: predicated region fallthrough
CT: control target
= control target key end

     0   :  { %s3265_s0 = inlined_call_operand.hbm [shape: bf16[4,8,32], index: 0, kind: input, shape index: {}]   ;;  %s3266_s1 = inlined_call_operand.hbm [shape: bf16[4,8,32], index: 1, kind: input, shape index: {}]   ;;  %s3267_s2 = inlined_call_operand.hbm [shape: bf16[4,8,32], index: 2, kind: input, shape index: {}]   ;;  %s3268_s3 = inlined_call_operand.hbm [shape: bf16[32,96], index: 3, kind: input, shape index: {}]   ;;  %s3269_s4 = inlined_call_operand.vmem [shape: f32[1,96], index: 4, kind: input, shape index: {}]   ;;  %s3270_s5 = inlined_call_operand.vmem [shape: bf16[32,32], index: 5, kind: input, shape index: {}]   ;;  %s3271_s6 = inlined_call_operand.vmem [shape: f32[1,32], index: 6, kind: input, shape index: {}]   ;;  %s3272_s7 = inlined_call_operand.hbm [shape: f32[4,8,32], index: 7, kind: output, shape index: {}]  }
   0x1   :  { %3296 = sst [smem:[#allocation22_spill]] %s3265_s0 }
   0x2   :  { %3297 = sst [smem:[#allocation23_spill]] %s3266_s1 }
   0x3   :  { %3298 = sst [smem:[#allocation24_spill]] %s3272_s7 }
   0x4   :  { %12 = vsyncpa [#allocation3], 0 }
   0x5   :  { %14 = vsyncpa [#allocation3 + $0x1], 0 }
   0x6   :  { %15 = vsyncpa [#allocation6], 0 }
   0x7   :  { %17 = vsyncpa [#allocation6 + $0x1], 0 }
   0x8   :  { %18 = vsyncpa [#allocation9], 0 }
   0x9   :  { %19 = vsyncpa [#allocation4], 0 }
   0xa   :  { %21 = vsyncpa [#allocation4 + $0x1], 0  ;;  %s2705_s24 = smov 0   ;;  %s2707_s25 = smov 0  }
   0xb   :  { %s2709_s26 = smov 0   ;;  %s2711_s27 = smov 0  }
   0xc LB: > { %3299 = sst [smem:[#allocation15_spill]] %s2635_s24  ;;  %s2726_s28 = sadd.s32 1, %s2647_s27   ;;  %s2647_s27 = sphi %s2711_s27, %s3334_s27   ;;  %s2643_s26 = sphi %s2709_s26, %s3336_s26   ;;  %s2639_s25 = sphi %s2707_s25, %s3338_s25   ;;  %s2635_s24 = sphi %s2705_s24, %s3337_s24  }
   0xd   : > { %3300 = sst [smem:[#allocation16_spill]] %s2643_s26  ;;  %s34_s29 = sadd.s32 1, %s2643_s26 }
   0xe   : > { %3301 = sst [smem:[#allocation17_spill]] %s2647_s27  ;;  %s31_s30 = ssub.s32 %s2647_s27, %s2726_s28 }
   0xf   : > { %3302 = sst [smem:[#allocation18_spill]] %s2726_s28  ;;  %p3273_p0 = scmp.ne.s32.totalorder %s2643_s26, %s2639_s25 }
  0x10   : > { %p32_p1 = scmp.eq.s32.totalorder %s31_s30, 0  ;;  %p42_p2 = scmp.eq.s32.totalorder %s2647_s27, 0 }
  0x11   : > { %p2371_p5 = scmp.lt.s32.totalorder %s2647_s27, 2  ;;  %s3278_s9 = sand.u32 1, %s2643_s26  }
  0x12   : > { %s2735_s8 = scalar_select %p32_p1, %s2643_s26, %s34_s29  }
  0x13   : > { %p43_p3 = por %p42_p2, %p3273_p0  ;;  %s2745_s10 = sshll.u32 %s3278_s9, 3 }
  0x14   : > { %3303 = sst [smem:[#allocation19_spill]] %s2735_s8  ;;  %s2748_s11 = sshll.u32 %s2647_s27, 7 }
  0x15   : > { %p2750_p6 = pnand %p2371_p5, %p43_p3  ;;  %s276_s13 = sand.u32 1, %s2647_s27  }
  0x16   : > { %s3305_s1 = sld [smem:[#allocation23_spill]]  ;;  %s280_s17 = scalar_lea.vmem [#allocation5], %s2745_s10 }
  0x17   : > { %s3304_s12 = scalar_select %p2750_p6, 1, 0 }
  0x18   : > { %s287_s18 = sshll.u32 %s280_s17, 4  ;;  %s2764_s19 = scalar_lea.sflag [#allocation6], %s276_s13  ;;  %s2762_s18 = int_to_ptr.vmem [resolvable:$true] %s287_s18 }
  0x19   : > { %p2770_p8 = pneg %p2750_p6 }
  0x1b   : > { %s3306_s21 = scalar_select %p2770_p8, 1, 0 }
  0x1c   : > { %s2759_s16 = scalar_lea.hbm %s3305_s1, %s2748_s11  ;;  %s2460_s29 = scalar_lea.hbm %s3305_s1, 256 }
  0x1d   : > { %s2455_s20 = scalar_lea.hbm %s2759_s16, 128  ;;  %p2461_p11 = scmp.lt.u32.totalorder %s2759_s16, %s3305_s1 }
  0x1e   : > { %p2456_p7 = scmp.ne.s32.totalorder %s2759_s16, %s2455_s20  ;;  %p2462_p12 = scmp.lt.u32.totalorder %s2460_s29, %s2455_s20 }
  0x1f   : > { %p2464_p1 = scmp.lt.u32.totalorder %s2455_s20, %s2759_s16 }
  0x20   : > { %p2458_p9 = pnand %p2770_p8, %p2456_p7  ;;  %p2463_p13 = por %p2462_p12, %p2461_p11 }
  0x22   : > { %p2459_p10 = pneg %p2458_p9  ;;  %p2465_p2 = por %p2464_p1, %p2463_p13 }
  0x24   : > { %p2466_p3 = pnand %p2465_p2, %p2459_p10 }
  0x26   : > { %2469 = shalt.err (!%p2466_p3)
}
  0x27   : > { %s2470_s13 = scalar_lea.vmem %s2762_s18, 128  ;;  %s2649_s15 = smov [#allocation5]  }
  0x28   : > { %p2471_p5 = scmp.ne.s32.totalorder %s2762_s18, %s2470_s13  ;;  %s2475_s17 = sshll.u32 %s2649_s15, 4  ;;  %s2476_s17 = int_to_ptr.vmem [resolvable:$false] %s2475_s17 }
  0x29   : > { %s2477_s22 = scalar_lea.vmem %s2476_s17, 256  ;;  %p2478_p4 = scmp.lt.s32.totalorder %s2762_s18, %s2476_s17 }
  0x2a   : > { %p2473_p7 = pnand %p2471_p5, %p2770_p8  ;;  %p2479_p0 = scmp.lt.s32.totalorder %s2477_s22, %s2470_s13 }
  0x2c   : > { %p2474_p9 = pneg %p2473_p7  ;;  %p2480_p11 = por %p2479_p0, %p2478_p4 }
  0x2e   : > { %p2481_p12 = pnand %p2480_p11, %p2474_p9 }
  0x30   : > { %2484 = shalt.err (!%p2481_p12)
}
  0x31   : > { %s3274_s20 = smov 64   ;;  %s3276_s23 = smov 4  }
  0x32   : > { %2362 = dma.hbm_to_vmem [thread:$0]  (!%p2750_p6), %s2759_s16, 128, %s2762_s18, %s2764_s19, %s3274_s20, %s3274_s20, %s3276_s23  }
  0x33   : > { %s2798_s29 = sadd.s32 4294967295, %s2647_s27   ;;  %s2026_s30 = sadd.s32 4294967294, %s2647_s27  }
  0x34   : > { %p47_p0 = scmp.ne.s32.totalorder %s2639_s25, %s2635_s24  ;;  %p3283_p4 = scmp.eq.s32.totalorder %s2798_s29, 0 }
  0x35   : > { %p207_p10 = scmp.eq.s32.totalorder %s2798_s29, 1  ;;  %p213_p13 = scmp.eq.s32.totalorder %s2026_s30, 1 }
  0x36   : > { %p2807_p1 = por %p3283_p4, %p47_p0  ;;  %p2027_p2 = scmp.ge.s32.totalorder %s2647_s27, 1 }
  0x37   : > { %p3308_p3 = scmp.ne.s32.totalorder %s2643_s26, %s2639_s25  ;;  %p2819_p7 = por %p213_p13, %p47_p0 }
  0x38   : > { %s3307_s14 = scalar_select %p2807_p1, 1, 0 }
  0x39   : > { %p2815_p5 = por %p207_p10, %p3308_p3  ;;  %p220_p9 = scmp.lt.s32.totalorder %s2647_s27, 3 }
  0x3a   : > { %s3311_s18 = scalar_select %p2819_p7, 1, 0 }
  0x3b   : > { %s3309_s16 = scalar_select %p2815_p5, 1, 0 }
  0x3c   : > { %3312 = sst [smem:[#allocation21_spill]] %s3311_s18  ;;  %p2824_p11 = pnand %p2027_p2, %p220_p9 }
  0x3d   : > { %3310 = sst [smem:[#allocation20_spill]] %s3309_s16  ;;  %s2652_s15 = smov [#allocation8]  }
  0x3e   : > { %s3313_s13 = scalar_select %p2824_p11, 1, 0 }
  0x3f   : > { %s232_s17 = sshll.u32 %s2652_s15, 4  ;;  %p2352_p12 = pneg %p2824_p11  ;;  %s2828_s17 = int_to_ptr.vmem [resolvable:$true] %s232_s17 }
  0x40   : > { %s3314_s0 = sld [smem:[#allocation22_spill]]  ;;  %s259_s23 = scalar_lea.vmem [#allocation2], %s2745_s10 }
  0x41   : > { %s266_s9 = sshll.u32 %s259_s23, 4  ;;  %p2841_p0 = pnand %p2352_p12, %p3283_p4  ;;  %s2845_s9 = int_to_ptr.vmem [resolvable:$true] %s266_s9 }
  0x42   : > { %s3316_s15 = sand.u32 1, %s2643_s26  }
  0x43   : > { %s3315_s1 = scalar_select %p2841_p0, 1, 0 }
  0x44   : > { %s2849_s8 = scalar_lea.sflag [#allocation3], %s3316_s15 }
  0x46   : > { %s2836_s20 = scalar_lea.hbm %s3314_s0, %s2748_s11  ;;  %s2490_s27 = scalar_lea.hbm %s3314_s0, 256 }
  0x47   : > { %s2485_s28 = scalar_lea.hbm %s2836_s20, 128  ;;  %p2491_p3 = scmp.lt.u32.totalorder %s2836_s20, %s3314_s0 }
  0x48   : > { %p2486_p10 = scmp.ne.s32.totalorder %s2836_s20, %s2485_s28  ;;  %p2492_p9 = scmp.lt.u32.totalorder %s2490_s27, %s2485_s28 }
  0x49   : > { %p2494_p4 = scmp.lt.u32.totalorder %s2485_s28, %s2836_s20 }
  0x4a   : > { %p2488_p13 = pnand %p2486_p10, %p2770_p8  ;;  %p2493_p12 = por %p2492_p9, %p2491_p3 }
  0x4c   : > { %p2489_p2 = pneg %p2488_p13  ;;  %p2495_p7 = por %p2494_p4, %p2493_p12 }
  0x4e   : > { %p2496_p5 = pnand %p2495_p7, %p2489_p2 }
  0x50   : > { %2499 = shalt.err (!%p2496_p5)
}
  0x51   : > { %s2500_s15 = scalar_lea.vmem %s2845_s9, 128  ;;  %s2653_s22 = smov [#allocation2]  }
  0x52   : > { %p2501_p10 = scmp.ne.s32.totalorder %s2845_s9, %s2500_s15  ;;  %s2505_s30 = sshll.u32 %s2653_s22, 4  ;;  %s2506_s30 = int_to_ptr.vmem [resolvable:$false] %s2505_s30 }
  0x53   : > { %s2507_s18 = scalar_lea.vmem %s2506_s30, 256  ;;  %p2508_p11 = scmp.lt.s32.totalorder %s2845_s9, %s2506_s30 }
  0x54   : > { %p2503_p13 = pnand %p2501_p10, %p2770_p8  ;;  %p2509_p0 = scmp.lt.s32.totalorder %s2507_s18, %s2500_s15 }
  0x56   : > { %p2504_p1 = pneg %p2503_p13  ;;  %p2510_p3 = por %p2509_p0, %p2508_p11 }
  0x58   : > { %p2511_p9 = pnand %p2510_p3, %p2504_p1 }
  0x5a   : > { %2514 = shalt.err (!%p2511_p9)
}
  0x5b   : > { %s3317_s27 = smov 4   ;;  %s3318_s28 = smov 64  }
  0x5c   : > { %2359 = dma.hbm_to_vmem [thread:$0]  (!%p2750_p6), %s2836_s20, 128, %s2845_s9, %s2849_s8, %s3318_s28, %s3318_s28, %s3317_s27  }
  0x5d   : > { %s2880_s0 = scalar_lea.hbm %s3267_s2, %s2748_s11  ;;  %s2515_s18 = scalar_lea.hbm %s3268_s3, 256 }
  0x5e   : > { %p2516_p4 = scmp.ne.s32.totalorder %s3268_s3, %s2515_s18  ;;  %p3319_p1 = scmp.ne.s32.totalorder %s3315_s1, 0 }
  0x5f   : > { %p2522_p0 = scmp.lt.u32.totalorder %s2515_s18, %s3268_s3 }
  0x60   : > { %p2517_p5 = pneg %p3319_p1 }
  0x62   : > { %p2518_p7 = pnand %p2517_p5, %p2516_p4 }
  0x64   : > { %p2519_p11 = pneg %p2518_p7 }
  0x66   : > { %p2524_p2 = pnand %p2522_p0, %p2519_p11 }
  0x68   : > { %2527 = shalt.err (!%p2524_p2)
}
  0x69   : > { %s2528_s8 = scalar_lea.vmem %s2828_s17, 256  ;;  %p2536_p3 = scmp.lt.s32.totalorder %s2828_s17, %s2828_s17 }
  0x6a   : > { %p2529_p12 = scmp.ne.s32.totalorder %s2828_s17, %s2528_s8  ;;  %p2537_p9 = scmp.lt.s32.totalorder %s2528_s8, %s2528_s8 }
  0x6c   : > { %p2531_p10 = pnand %p2529_p12, %p2517_p5  ;;  %p2538_p6 = por %p2537_p9, %p2536_p3 }
  0x6e   : > { %p2532_p13 = pneg %p2531_p10 }
  0x70   : > { %p2539_p8 = pnand %p2538_p6, %p2532_p13 }
  0x72   : > { %2542 = shalt.err (!%p2539_p8)
}
  0x73   : > { %2355 = dma.hbm_to_vmem [thread:$0]  (!%p3319_p1), %s3268_s3, 256, %s2828_s17, [#allocation9], %s3318_s28, %s3318_s28, %s3317_s27  }
  0x74   : > { %s301_s26 = scalar_lea.vmem [#allocation7], %s2745_s10  ;;  %s2543_s11 = scalar_lea.hbm %s2880_s0, 128 }
  0x75   : > { %s308_s9 = sshll.u32 %s301_s26, 4  ;;  %p2544_p6 = scmp.ne.s32.totalorder %s2880_s0, %s2543_s11  ;;  %s2907_s9 = int_to_ptr.vmem [resolvable:$true] %s308_s9 }
  0x76   : > { %p3320_p8 = scmp.ne.s32.totalorder %s3306_s21, 0  ;;  %s2548_s16 = scalar_lea.hbm %s3267_s2, 256 }
  0x77   : > { %p2549_p7 = scmp.lt.u32.totalorder %s2880_s0, %s3267_s2  ;;  %p2550_p11 = scmp.lt.u32.totalorder %s2548_s16, %s2543_s11 }
  0x78   : > { %p2546_p4 = pnand %p2544_p6, %p3320_p8  ;;  %p2552_p1 = scmp.lt.u32.totalorder %s2543_s11, %s2880_s0 }
  0x79   : > { %p2551_p0 = por %p2550_p11, %p2549_p7 }
  0x7a   : > { %p2547_p5 = pneg %p2546_p4 }
  0x7b   : > { %p2553_p2 = por %p2552_p1, %p2551_p0 }
  0x7d   : > { %p2554_p12 = pnand %p2553_p2, %p2547_p5 }
  0x7f   : > { %2557 = shalt.err (!%p2554_p12)
}
  0x80   : > { %s2558_s10 = scalar_lea.vmem %s2907_s9, 128  ;;  %s2654_s17 = smov [#allocation7]  }
  0x81   : > { %p2559_p10 = scmp.ne.s32.totalorder %s2907_s9, %s2558_s10  ;;  %s2563_s15 = sshll.u32 %s2654_s17, 4  ;;  %s2564_s15 = int_to_ptr.vmem [resolvable:$false] %s2563_s15 }
  0x82   : > { %s2565_s30 = scalar_lea.vmem %s2564_s15, 256  ;;  %p2566_p9 = scmp.lt.s32.totalorder %s2907_s9, %s2564_s15 }
  0x83   : > { %p2561_p13 = pnand %p2559_p10, %p3320_p8  ;;  %p2567_p6 = scmp.lt.s32.totalorder %s2565_s30, %s2558_s10 }
  0x85   : > { %p2562_p3 = pneg %p2561_p13  ;;  %p2568_p4 = por %p2567_p6, %p2566_p9 }
  0x87   : > { %p2569_p7 = pnand %p2568_p4, %p2562_p3 }
  0x89   : > { %2572 = shalt.err (!%p2569_p7)
}
  0x8a   : > { %p3321_p5 = scmp.ne.s32.totalorder %s3304_s12, 0  ;;  %p3322_p8 = scmp.ne.s32.totalorder %s3313_s13, 0 }
  0x8b   : > { %s2937_s21 = sand.u32 (!%p3322_p8), 1, %s2639_s25   ;;  %p3323_p11 = scmp.ne.s32.totalorder (!%p3322_p8), %s3307_s14, 0 }
  0x8c   : > { %2365 = dma.hbm_to_vmem [thread:$0]  (!%p3321_p5), %s2880_s0, 128, %s2907_s9, %s2764_s19, %s3318_s28, %s3318_s28, %s3317_s27  }
  0x8d   : > { %320 = sbr.rel (%p3322_p8) target bundleno = 2994 (0xbb2), region = 48  ;;  %s2940_s18 = sshll.u32 (!%p3322_p8), %s2937_s21, 3 }
  0x8e   : > { %s323_s12 = scalar_lea.sflag (!%p3322_p8), [#allocation3], %s2937_s21  ;;  %s326_s8 = scalar_lea.vmem (!%p3322_p8), [#allocation2], %s2940_s18 }
  0x94   : > { %2618 = dma.done.wait (%p3323_p11), %s323_s12, 128  }
  0x95   : > { %2620 = vsyncadd (%p3323_p11), %s323_s12, 4294967168  ;;  %s331_s0 = sand.u32 1, %s2798_s29   ;;  %s335_s13 = scalar_lea.vmem [#allocation5], %s2940_s18 }
  0x96   : > { %s332_s19 = scalar_lea.sflag [#allocation6], %s331_s0 }
  0x97   : > { %2622 = dma.done.wait (%p3323_p11), %s332_s19, 256  }
  0x98   : > { %2624 = vsyncadd (%p3323_p11), %s332_s19, 4294967040  ;;  %s344_s27 = scalar_lea.vmem [#allocation7], %s2940_s18  ;;  %p3324_p0 = scmp.eq.s32.totalorder %s2798_s29, 0 }
  0x9a   : > { %2626 = dma.done.wait (%p3324_p0), [#allocation9], 256   ;;  %p3325_p1 = pmov %p3324_p0 }
  0x9b   : > { %v2655_v0 = vmov 0.0   ;;  %vm2656_vm0 = vmmov 0   ;;  %v2418_v1 = vld [vmem:[#allocation8] sm:$0xff]   ;;  %s2657_s14 = smov 96   ;;  %v2419_v2 = vld [vmem:[#allocation8 + $0x8] sm:$0xff]   ;;  %v2421_v4 = vld [vmem:[%s326_s8] sm:$0xff]  }
  0x9c   : > { %2628 = vsyncadd (%p3325_p1), [#allocation9], 4294967040  ;;  %2154 = vmatprep.subr.bf16.mxu1 %v2655_v0  ;;  %2158 = vmatprep.mubr.msk.bf16.mxu1 %vm2656_vm0, %v2655_v0  ;;  %v2968_v3 = vld [vmem:[%s3269_s4] ss:$0 sm:$0xff]  ;;  %vm433_vm1 = vcmask 261120   ;;  %v2420_v7 = vld [vmem:[%s335_s13] sm:$0xff]  }
  0x9d   : > { %2146 = vmatprep.subr.bf16.mxu0 %v2655_v0  ;;  %2150 = vmatprep.mubr.msk.bf16.mxu0 %vm2656_vm0, %v2655_v0  ;;  %s2658_s24 = smov 64   ;;  %s2659_s26 = smov 120   ;;  %v2422_v25 = vld [vmem:[%s344_s27] sm:$0xff]   ;;  %vm641_vm2 = vcmask 1043456   ;;  %vm637_vm3 = vcmask 64512  }
  0x9e   : > { %483 = vrot.lane.b32.xlu0 %v2418_v1, %s2657_s14  ;;  %2147 = vmatpush3.bf16.msra.mxu0 %v2418_v1  ;;  %s2660_s9 = smov 112   ;;  %s2661_s11 = smov 104   ;;  %v399_v58 = vld [vmem:[%s3270_s5] sm:$0xf] }
  0x9f   : > { %2148 = vmatprep.subr.bf16.mxu0 %v2655_v0  ;;  %489 = vrot.lane.b32.xlu1 %v2968_v3, %s2657_s14  ;;  %v3050_v59 = vsel %vm641_vm2, %v399_v58, 0  ;;  %s2044_s30 = sshll.u32 %s2937_s21, 4  ;;  %s3326_s0 = sld [smem:[#allocation20_spill]] }
  0xa0   : > { %s3188_s8 = scalar_lea.vmem [#allocation10], %s2044_s30  ;;  %s2088_s13 = sshll.u32 %s2798_s29, 8 }
  0xa1   : > { %s1900_s19 = sshll.u32 %s3188_s8, 4  ;;  %s3327_s28 = sld [smem:[#allocation24_spill]]  ;;  %s3213_s19 = int_to_ptr.vmem [resolvable:$true] %s1900_s19 }
  0xa2   : > { %485 = vrot.lane.b32.xlu0 %v2419_v2, %s2657_s14  ;;  %2149 = vmatpush3.bf16.msra.mxu0 %v2419_v2  ;;  %s2573_s29 = scalar_lea.vmem %s3213_s19, 256 }
  0xa3   : > { %2162 = vmatprep.subr.bf16.mxu0 %v2655_v0  ;;  %p2574_p2 = scmp.ne.s32.totalorder %s3213_s19, %s2573_s29 }
  0xa5   : > { %2151 = vmatmul.mubr.msk.bf16.vlgmr.msra.gmra.mrb[0].mxu0 %vm433_vm1, %v2421_v4  ;;  %p3328_p12 = scmp.ne.s32.totalorder %s3326_s0, 0 }
  0xa6   : > { %2166 = vmatprep.mubr.msk.bf16.mxu0 %vm2656_vm0, %v2655_v0  ;;  %541 = vrot.lane.b32.xlu0 %v2418_v1, %s2658_s24 }
  0xa7   : > { %s3218_s7 = scalar_lea.hbm %s3327_s28, %s2088_s13  ;;  %p2575_p10 = pnand %p2574_p2, %p3328_p12 }
  0xa9   : > { %p2576_p13 = pneg %p2575_p10 }
  0xaa   : > { %543 = vrot.lane.b32.xlu0 %v2419_v2, %s2658_s24 }
 0x110   : > { %v484_v5 = vpop.permute.xlu0 %483 }
 0x111   : > { %2155 = vmatpush3.bf16.msra.mxu1 %v484_v5  ;;  %v490_v8 = vpop.permute.xlu1 %489 }
 0x112   : > { %2156 = vmatprep.subr.bf16.mxu1 %v2655_v0 }
 0x114   : > { %v486_v6 = vpop.permute.xlu0 %485 }
 0x115   : > { %2157 = vmatpush3.bf16.msra.mxu1 %v486_v6 }
 0x116   : > { %2170 = vmatprep.subr.bf16.mxu1 %v2655_v0 }
 0x118   : > { %2159 = vmatmul.mubr.msk.bf16.vlgmr.msra.gmra.mrb[0].mxu1 %vm433_vm1, %v2420_v7  ;;  %v542_v22 = vpop.permute.xlu0 %541 }
 0x119   : > { %2172 = vmatprep.mubr.msk.bf16.mxu1 %vm2656_vm0, %v2655_v0  ;;  %2163 = vmatpush3.bf16.msra.mxu0 %v542_v22 }
 0x11a   : > { %2164 = vmatprep.subr.bf16.mxu0 %v2655_v0 }
 0x11c   : > { %v544_v24 = vpop.permute.xlu0 %543 }
 0x11d   : > { %2165 = vmatpush3.bf16.msra.mxu0 %v544_v24 }
 0x11e   : > { %2176 = vmatprep.subr.bf16.mxu0 %v2655_v0 }
 0x120   : > { %2167 = vmatmul.mubr.msk.bf16.vlgmr.msra.gmra.mrb[4].mxu0 %vm433_vm1, %v2422_v25 }
 0x121   : > { %2178 = vmatprep.mubr.msk.bf16.mxu0 %vm2656_vm0, %v2655_v0 }
 0x178   : > { %v471_v14 = vpop.f32.mrb[0].mxu0 }
 0x179   : > { %v2152_v16 = vpop.f32.mrb[1].mxu0  ;;  %v472_v19 = vadd.f32 %v2968_v3, %v471_v14 }
 0x17a   : > { %v474_v17 = vpop.f32.mrb[2].mxu0 }
 0x17b   : > { %v2153_v18 = vpop.f32.mrb[3].mxu0  ;;  %v475_v20 = vadd.f32 %v2968_v3, %v474_v17 }
 0x17d   : > { %v2985_v21 = vpack.c.bf16 %v475_v20, %v472_v19 }
 0x17f   : > { %v3038_v57 = vrot.slane %v2985_v21, 4 }
 0x1eb   : > { %v529_v9 = vpop.f32.mrb[0].mxu1 }
 0x1ec   : > { %v530_v10 = vadd.f32 %v529_v9, %v490_v8  ;;  %v2160_v11 = vpop.f32.mrb[1].mxu1 }
 0x1ed   : > { %v532_v12 = vpop.f32.mrb[2].mxu1 }
 0x1ee   : > { %595 = vxpose.xlu1.b32.start [1/2] (short) (narrow) %v530_v10, 32  ;;  %v2161_v13 = vpop.f32.mrb[3].mxu1  ;;  %v533_v15 = vadd.f32 %v532_v12, %v490_v8 }
 0x1f2   : > { %596 = vxpose.xlu1.b32.end [2/2] (short) (narrow) %v533_v15, 32 }
 0x1f3   : > { %v587_v34 = vpop.f32.mrb[4].mxu0 }
 0x1f4   : > { %v2168_v35 = vpop.f32.mrb[5].mxu0 }
 0x1f5   : > { %v590_v36 = vpop.f32.mrb[6].mxu0 }
 0x1f6   : > { %v2169_v37 = vpop.f32.mrb[7].mxu0 }
 0x218   : > { %792 = vrot.lane.b32.xlu1 %v2985_v21, %s2659_s26 }
 0x26e   : > { %v611_v23 = vpop.trf.xlu1 }
 0x272   : > { %v612_v26 = vpop.trf.xlu1 }
 0x273   : > { %v627_v27 = vpack.c.bf16 %v612_v26, %v611_v23 }
 0x275   : > { %v643_v28 = vsel %vm641_vm2, %v627_v27, 0  ;;  %v795_v47 = vrot.slane %v627_v27, 4 }
 0x276   : > { %2171 = vmatpush3.bf16.msra.mxu1 %v643_v28  ;;  %v613_v46 = vpop.trf.xlu1 }
 0x277   : > { %2182 = vmatprep.subr.bf16.mxu1 %v2655_v0  ;;  %v800_v50 = vsel %vm641_vm2, %v795_v47, 0 }
 0x279   : > { %2173 = vmatmul.mubr.msk.bf16.vlgmr.msra.gmra.mrb[4].mxu1 %vm637_vm3, %v2985_v21 }
 0x27a   : > { %2184 = vmatprep.mubr.msk.bf16.mxu1 %vm2656_vm0, %v2655_v0  ;;  %v614_v51 = vpop.trf.xlu1  ;;  %2183 = vmatpush3.bf16.msra.mxu1 %v3050_v59 }
 0x27b   : > { %v3024_v52 = vpack.c.bf16 %v614_v51, %v613_v46  ;;  %2194 = vmatprep.subr.bf16.mxu1 %v2655_v0 }
 0x27d   : > { %v957_v54 = vsel %vm641_vm2, %v3024_v52, 0 }
 0x28a   : > { %v793_v53 = vpop.permute.xlu1 %792 }
 0x34c   : > { %v679_v29 = vpop.f32.mrb[4].mxu1 }
 0x34d   : > { %v2174_v30 = vpop.f32.mrb[5].mxu1  ;;  %v685_v31 = vsel %vm637_vm3, %v679_v29, -inf }
 0x34e   : > { %686 = vmax.xlane.f32.xlu0 %v685_v31  ;;  %v682_v32 = vpop.f32.mrb[6].mxu1 }
 0x34f   : > { %v2175_v33 = vpop.f32.mrb[7].mxu1 }
 0x364   : > { %547 = vrot.lane.b32.xlu0 %v2968_v3, %s2658_s24  ;;  %s1887_s24 = scalar_lea.sflag [#allocation4], %s2937_s21 }
 0x368   : > { %951 = vrot.lane.b32.xlu0 %v2985_v21, %s2660_s9 }
 0x3db   : > { %v687_v38 = vpop.xlane.xlu0 %686 }
 0x3dc   : > { %v688_v39 = vsub.f32 %v679_v29, %v687_v38 }
 0x3de   : > { %v689_v40 = vmul.f32 1.442695, %v688_v39 }
 0x3df   : > { %v548_v41 = vpop.permute.xlu0 %547 }
 0x3e0   : > { %2423 = vpow2.f32 %v689_v40  ;;  %v588_v42 = vadd.f32 %v587_v34, %v548_v41  ;;  %v591_v43 = vadd.f32 %v590_v36, %v548_v41 }
 0x3e2   : > { %v3009_v44 = vpack.c.bf16 %v591_v43, %v588_v42 }
 0x3e3   : > { %v952_v55 = vpop.permute.xlu0 %951 }
 0x3e4   : > { %1009 = vrot.lane.b32.xlu1 %v3009_v44, %s2660_s9  ;;  %v699_v45 = vsel %vm641_vm2, %v3009_v44, 0  ;;  %v3081_v35 = vrot.slane %v3009_v44, 4 }
 0x3e5   : > { %2177 = vmatpush3.bf16.msra.mxu0 %v699_v45 }
 0x3e6   : > { %2188 = vmatprep.subr.bf16.mxu0 %v2655_v0  ;;  %v1330_v36 = vsel %vm641_vm2, %v3081_v35, 0 }
 0x3e8   : > { %1107 = vrot.lane.b32.xlu1 %v2985_v21, %s2661_s11 }
 0x3ea   : > { %v2424_v48 = vpop.eup %2423 }
 0x3eb   : > { %v694_v49 = vpack.c.bf16 %v2424_v48, %v2424_v48  ;;  %v691_v56 = vsel %vm637_vm3, %v2424_v48, 0.0 }
 0x3ec   : > { %1267 = vrot.lane.b32.xlu1 %v627_v27, %s2659_s26  ;;  %v1110_v27 = vrot.slane %v3024_v52, 4 }
 0x3ed   : > { %2179 = vmatmul.mubr.msk.bf16.vlgmr.msra.gmra.mrb[8].mxu0 %vm637_vm3, %v694_v49 }
 0x3ee   : > { %2189 = vmatpush3.bf16.msra.mxu0 %v800_v50  ;;  %2190 = vmatprep.mubr.msk.bf16.mxu0 %vm2656_vm0, %v2655_v0  ;;  %v1115_v31 = vsel %vm641_vm2, %v1110_v27, 0 }
 0x3ef   : > { %2206 = vmatprep.subr.bf16.mxu0 %v2655_v0 }
 0x3f5   : > { %2191 = vmatmul.mubr.msk.bf16.vlgmr.msra.gmra.mrb[12].mxu0 %vm637_vm3, %v793_v53 }
 0x3f6   : > { %2207 = vmatpush3.bf16.msra.mxu0 %v957_v54  ;;  %2208 = vmatprep.mubr.msk.bf16.mxu0 %vm2656_vm0, %v2655_v0 }
 0x3f7   : > { %2212 = vmatprep.subr.bf16.mxu0 %v2655_v0 }
 0x3fd   : > { %2209 = vmatmul.mubr.msk.bf16.vlgmr.msra.gmra.mrb[16].mxu0 %vm637_vm3, %v952_v55 }
 0x3fe   : > { %2214 = vmatprep.mubr.msk.bf16.mxu0 %vm2656_vm0, %v2655_v0 }
 0x410   : > { %692 = vadd.xlane.f32.xlu1 %v691_v56 }
 0x421   : > { %1421 = vrot.lane.b32.xlu1 %v795_v47, %s2659_s26 }
 0x425   : > { %1419 = vrot.lane.b32.xlu1 %v3038_v57, %s2659_s26 }
 0x429   : > { %1576 = vrot.lane.b32.xlu1 %v3024_v52, %s2659_s26 }
 0x42d   : > { %1574 = vrot.lane.b32.xlu1 %v3038_v57, %s2660_s9 }
 0x456   : > { %v1010_v60 = vpop.permute.xlu1 %1009 }
 0x457   : > { %v1015_v61 = vsel %vm641_vm2, %v1010_v60, 0 }
 0x458   : > { %2213 = vmatpush3.bf16.msra.mxu0 %v1015_v61 }
 0x459   : > { %2224 = vmatprep.subr.bf16.mxu0 %v2655_v0 }
 0x45a   : > { %v1108_v62 = vpop.permute.xlu1 %1107 }
 0x45e   : > { %v1268_v63 = vpop.permute.xlu1 %1267 }
 0x45f   : > { %v1273_v34 = vsel %vm641_vm2, %v1268_v63, 0 }
 0x49d   : > { %v693_v1 = vpop.xlane.xlu1 %692 }
 0x49e   : > { %2425 = vrcp.f32 %v693_v1 }
 0x4a1   : > { %v1422_v60 = vpop.permute.xlu1 %1421 }
 0x4a5   : > { %v1420_v61 = vpop.permute.xlu1 %1419 }
 0x4a8   : > { %v2426_v2 = vpop.eup %2425 }
 0x4a9   : > { %v1577_v1 = vpop.permute.xlu1 %1576 }
 0x4c0   : > { %v735_v3 = vpop.f32.mrb[8].mxu0 }
 0x4c1   : > { %v742_v4 = vmul.f32 %v2426_v2, %v735_v3  ;;  %v2180_v5 = vpop.f32.mrb[9].mxu0 }
 0x4c2   : > { %v738_v6 = vpop.f32.mrb[10].mxu0 }
 0x4c3   : > { %v743_v7 = vpack.c.bf16 %v742_v4, %v742_v4  ;;  %v2181_v8 = vpop.f32.mrb[11].mxu0  ;;  %v1575_v4 = vpop.permute.xlu1 %1574 }
 0x4c5   : > { %2185 = vmatmul.mubr.msk.bf16.vlgmr.msra.gmra.mrb[8].mxu1 %vm637_vm3, %v743_v7 }
 0x4c6   : > { %2196 = vmatprep.mubr.msk.bf16.mxu1 %vm2656_vm0, %v2655_v0 }
 0x4c8   : > { %v836_v9 = vpop.f32.mrb[12].mxu0 }
 0x4c9   : > { %v2192_v10 = vpop.f32.mrb[13].mxu0  ;;  %v842_v18 = vsel %vm637_vm3, %v836_v9, -inf }
 0x4ca   : > { %v839_v11 = vpop.f32.mrb[14].mxu0  ;;  %v401_v10 = vld [vmem:[%s3270_s5 + $0x8] sm:$0xf] }
 0x4cb   : > { %v2193_v12 = vpop.f32.mrb[15].mxu0 }
 0x4cc   : > { %v1427_v12 = vsel %vm641_vm2, %v1422_v60, 0 }
 0x4d0   : > { %v993_v13 = vpop.f32.mrb[16].mxu0 }
 0x4d1   : > { %v2210_v14 = vpop.f32.mrb[17].mxu0  ;;  %v999_v15 = vsel %vm637_vm3, %v993_v13, -inf }
 0x4d2   : > { %1000 = vmax.xlane.f32.xlu0 %v999_v15  ;;  %v996_v16 = vpop.f32.mrb[18].mxu0  ;;  %v3119_v15 = vsel %vm641_vm2, %v401_v10, 0 }
 0x4d3   : > { %v2211_v17 = vpop.f32.mrb[19].mxu0 }
 0x4d6   : > { %843 = vmax.xlane.f32.xlu0 %v842_v18  ;;  %v1582_v18 = vsel %vm641_vm2, %v1577_v1, 0 }
 0x4ec   : > { %853 = vrot.lane.b32.xlu0 %v3009_v44, %s2659_s26 }
 0x55f   : > { %v1001_v19 = vpop.xlane.xlu0 %1000 }
 0x560   : > { %v1002_v20 = vsub.f32 %v993_v13, %v1001_v19 }
 0x562   : > { %v1003_v21 = vmul.f32 1.442695, %v1002_v20 }
 0x563   : > { %v844_v22 = vpop.xlane.xlu0 %843 }
 0x564   : > { %2427 = vpow2.f32 %v1003_v21  ;;  %v845_v23 = vsub.f32 %v836_v9, %v844_v22 }
 0x566   : > { %v846_v24 = vmul.f32 1.442695, %v845_v23 }
 0x567   : > { %v854_v25 = vpop.permute.xlu0 %853 }
 0x568   : > { %2429 = vpow2.f32 %v846_v24  ;;  %v859_v26 = vsel %vm641_vm2, %v854_v25, 0 }
 0x569   : > { %2195 = vmatpush3.bf16.msra.mxu1 %v859_v26 }
 0x56a   : > { %2200 = vmatprep.subr.bf16.mxu1 %v2655_v0 }
 0x56e   : > { %v2428_v28 = vpop.eup %2427 }
 0x56f   : > { %v1005_v29 = vsel %vm637_vm3, %v2428_v28, 0.0  ;;  %v1008_v30 = vpack.c.bf16 %v2428_v28, %v2428_v28 }
 0x570   : > { %1006 = vadd.xlane.f32.xlu1 %v1005_v29 }
 0x571   : > { %2215 = vmatmul.mubr.msk.bf16.vlgmr.msra.gmra.mrb[20].mxu0 %vm637_vm3, %v1008_v30 }
 0x572   : > { %v2430_v32 = vpop.eup %2429  ;;  %2225 = vmatpush3.bf16.msra.mxu0 %v1115_v31  ;;  %2226 = vmatprep.mubr.msk.bf16.mxu0 %vm2656_vm0, %v2655_v0 }
 0x573   : > { %v851_v33 = vpack.c.bf16 %v2430_v32, %v2430_v32  ;;  %2242 = vmatprep.subr.bf16.mxu0 %v2655_v0  ;;  %v848_v55 = vsel %vm637_vm3, %v2430_v32, 0.0 }
 0x575   : > { %2197 = vmatmul.mubr.msk.bf16.vlgmr.msra.gmra.mrb[12].mxu1 %vm637_vm3, %v851_v33 }
 0x576   : > { %2202 = vmatprep.mubr.msk.bf16.mxu1 %vm2656_vm0, %v2655_v0 }
 0x579   : > { %2227 = vmatmul.mubr.msk.bf16.vlgmr.msra.gmra.mrb[24].mxu0 %vm637_vm3, %v1108_v62 }
 0x57a   : > { %2243 = vmatpush3.bf16.msra.mxu0 %v1273_v34  ;;  %2244 = vmatprep.mubr.msk.bf16.mxu0 %vm2656_vm0, %v2655_v0 }
 0x57b   : > { %2248 = vmatprep.subr.bf16.mxu0 %v2655_v0 }
 0x581   : > { %2245 = vmatmul.mubr.msk.bf16.vlgmr.msra.gmra.mrb[28].mxu0 %vm637_vm3, %v3038_v57  ;;  %1634 = vrot.lane.b32.xlu1 %v3081_v35, %s2660_s9 }
 0x582   : > { %2249 = vmatpush3.bf16.msra.mxu0 %v1330_v36  ;;  %2250 = vmatprep.mubr.msk.bf16.mxu0 %vm2656_vm0, %v2655_v0 }
 0x583   : > { %2260 = vmatprep.subr.bf16.mxu0 %v2655_v0 }
 0x585   : > { %1731 = vrot.lane.b32.xlu1 %v1110_v27, %s2659_s26 }
 0x589   : > { %1729 = vrot.lane.b32.xlu1 %v3038_v57, %s2661_s11  ;;  %v400_v57 = vld [vmem:[%s3270_s5 + $0x4] sm:$0xf] }
 0x58a   : > { %v3106_v58 = vsel %vm641_vm2, %v400_v57, 0 }
 0x58b   : > { %2201 = vmatpush3.bf16.msra.mxu1 %v3106_v58 }
 0x58c   : > { %2218 = vmatprep.subr.bf16.mxu1 %v2655_v0 }
 0x5fd   : > { %v1007_v5 = vpop.xlane.xlu1 %1006 }
 0x601   : > { %v1635_v21 = vpop.permute.xlu1 %1634 }
 0x602   : > { %v1640_v24 = vsel %vm641_vm2, %v1635_v21, 0 }
 0x644   : > { %v3095_v37 = vpop.f32.mrb[20].mxu0 }
 0x645   : > { %v2216_v38 = vpop.f32.mrb[21].mxu0 }
 0x646   : > { %v1054_v39 = vpop.f32.mrb[22].mxu0 }
 0x647   : > { %v2217_v40 = vpop.f32.mrb[23].mxu0 }
 0x648   : > { %v895_v41 = vpop.f32.mrb[12].mxu1 }
 0x649   : > { %v2198_v42 = vpop.f32.mrb[13].mxu1 }
 0x64a   : > { %v898_v43 = vpop.f32.mrb[14].mxu1 }
 0x64b   : > { %v2199_v45 = vpop.f32.mrb[15].mxu1 }
 0x64c   : > { %v1151_v46 = vpop.f32.mrb[24].mxu0 }
 0x64d   : > { %v2228_v47 = vpop.f32.mrb[25].mxu0  ;;  %v1157_v56 = vsel %vm637_vm3, %v1151_v46, -inf }
 0x64e   : > { %v1154_v48 = vpop.f32.mrb[26].mxu0 }
 0x64f   : > { %v2229_v49 = vpop.f32.mrb[27].mxu0  ;;  %v402_v48 = vld [vmem:[%s3270_s5 + $0xc] sm:$0xf] }
 0x650   : > { %v3155_v49 = vsel %vm641_vm2, %v402_v48, 0 }
 0x654   : > { %v1309_v50 = vpop.f32.mrb[28].mxu0 }
 0x655   : > { %v2246_v51 = vpop.f32.mrb[29].mxu0  ;;  %v1315_v52 = vsel %vm637_vm3, %v1309_v50, -inf }
 0x656   : > { %1316 = vmax.xlane.f32.xlu0 %v1315_v52  ;;  %v1312_v53 = vpop.f32.mrb[30].mxu0 }
 0x657   : > { %v2247_v54 = vpop.f32.mrb[31].mxu0 }
 0x65a   : > { %849 = vadd.xlane.f32.xlu0 %v848_v55 }
 0x65e   : > { %1158 = vmax.xlane.f32.xlu0 %v1157_v56 }
 0x674   : > { %1167 = vrot.lane.b32.xlu0 %v3009_v44, %s2661_s11 }
 0x6e3   : > { %v1317_v62 = vpop.xlane.xlu0 %1316 }
 0x6e4   : > { %v1318_v63 = vsub.f32 %v1309_v50, %v1317_v62  ;;  %v1732_v50 = vpop.permute.xlu1 %1731 }
 0x6e6   : > { %v1319_v2 = vmul.f32 1.442695, %v1318_v63 }
 0x6e7   : > { %v850_v3 = vpop.xlane.xlu0 %849 }
 0x6e8   : > { %2431 = vpow2.f32 %v1319_v2  ;;  %v1730_v55 = vpop.permute.xlu1 %1729 }
 0x6e9   : > { %2433 = vrcp.f32 %v850_v3 }
 0x6ea   : > { %2435 = vrcp.f32 %v1007_v5 }
 0x6eb   : > { %v1159_v44 = vpop.xlane.xlu0 %1158 }
 0x6ec   : > { %v1160_v13 = vsub.f32 %v1151_v46, %v1159_v44 }
 0x6ee   : > { %v1161_v16 = vmul.f32 1.442695, %v1160_v13 }
 0x6ef   : > { %v1168_v20 = vpop.permute.xlu0 %1167 }
 0x6f0   : > { %2437 = vpow2.f32 %v1161_v16  ;;  %v1173_v23 = vsel %vm641_vm2, %v1168_v20, 0 }
 0x6f2   : > { %v2432_v6 = vpop.eup %2431 }
 0x6f3   : > { %v2434_v7 = vpop.eup %2433  ;;  %v1321_v8 = vsel %vm637_vm3, %v2432_v6, 0.0  ;;  %v1324_v9 = vpack.c.bf16 %v2432_v6, %v2432_v6 }
 0x6f4   : > { %v902_v11 = vmul.f32 %v2434_v7, %v895_v41  ;;  %1322 = vadd.xlane.f32.xlu1 %v1321_v8  ;;  %v2436_v17 = vpop.eup %2435 }
 0x6f5   : > { %2251 = vmatmul.mubr.msk.bf16.vlgmr.msra.gmra.mrb[32].mxu0 %vm637_vm3, %v1324_v9  ;;  %v1058_v19 = vmul.f32 %v2436_v17, %v3095_v37 }
 0x6f6   : > { %2261 = vmatpush3.bf16.msra.mxu0 %v1427_v12  ;;  %v903_v14 = vpack.c.bf16 %v902_v11, %v902_v11  ;;  %2262 = vmatprep.mubr.msk.bf16.mxu0 %vm2656_vm0, %v2655_v0 }
 0x6f7   : > { %2278 = vmatprep.subr.bf16.mxu0 %v2655_v0  ;;  %v1059_v22 = vpack.c.bf16 %v1058_v19, %v1058_v19 }
 0x6f8   : > { %2203 = vmatmul.mubr.msk.bf16.vlgmr.msra.gmra.mrb[8].mxu1 %vm637_vm3, %v903_v14  ;;  %v3185_v14 = vld [vmem:[%s3271_s6] ss:$0 sm:$0xff] }
 0x6f9   : > { %2219 = vmatpush3.bf16.msra.mxu1 %v3119_v15  ;;  %2220 = vmatprep.mubr.msk.bf16.mxu1 %vm2656_vm0, %v2655_v0 }
 0x6fa   : > { %2230 = vmatprep.subr.bf16.mxu1 %v2655_v0  ;;  %v2438_v25 = vpop.eup %2437 }
 0x6fb   : > { %v1166_v26 = vpack.c.bf16 %v2438_v25, %v2438_v25  ;;  %v1163_v41 = vsel %vm637_vm3, %v2438_v25, 0.0 }
 0x6fd   : > { %2263 = vmatmul.mubr.msk.bf16.vlgmr.msra.gmra.mrb[36].mxu0 %vm637_vm3, %v1420_v61 }
 0x6fe   : > { %2279 = vmatpush3.bf16.msra.mxu0 %v1582_v18  ;;  %2280 = vmatprep.mubr.msk.bf16.mxu0 %vm2656_vm0, %v2655_v0 }
 0x6ff   : > { %2284 = vmatprep.subr.bf16.mxu0 %v2655_v0 }
 0x704   : > { %2221 = vmatmul.mubr.msk.bf16.vlgmr.msra.gmra.mrb[8].mxu1 %vm637_vm3, %v1059_v22 }
 0x705   : > { %2231 = vmatpush3.bf16.msra.mxu1 %v1173_v23  ;;  %2281 = vmatmul.mubr.msk.bf16.vlgmr.msra.gmra.mrb[40].mxu0 %vm637_vm3, %v1575_v4  ;;  %v1737_v4 = vsel %vm641_vm2, %v1732_v50, 0 }
 0x706   : > { %2285 = vmatpush3.bf16.msra.mxu0 %v1640_v24  ;;  %2232 = vmatprep.mubr.msk.bf16.mxu1 %vm2656_vm0, %v2655_v0 }
 0x707   : > { %2236 = vmatprep.subr.bf16.mxu1 %v2655_v0  ;;  %2286 = vmatprep.mubr.msk.bf16.mxu0 %vm2656_vm0, %v2655_v0 }
 0x708   : > { %2296 = vmatprep.subr.bf16.mxu0 %v2655_v0 }
 0x70c   : > { %2233 = vmatmul.mubr.msk.bf16.vlgmr.msra.gmra.mrb[16].mxu1 %vm637_vm3, %v1166_v26 }
 0x70d   : > { %2238 = vmatprep.mubr.msk.bf16.mxu1 %vm2656_vm0, %v2655_v0  ;;  %2237 = vmatpush3.bf16.msra.mxu1 %v3155_v49 }
 0x70e   : > { %2254 = vmatprep.subr.bf16.mxu1 %v2655_v0 }
 0x781   : > { %v1323_v57 = vpop.xlane.xlu1 %1322 }
 0x7c8   : > { %v1366_v27 = vpop.f32.mrb[32].mxu0 }
 0x7c9   : > { %v2252_v28 = vpop.f32.mrb[33].mxu0 }
 0x7ca   : > { %v1369_v29 = vpop.f32.mrb[34].mxu0 }
 0x7cb   : > { %v2253_v30 = vpop.f32.mrb[35].mxu0 }
 0x7d0   : > { %v1463_v31 = vpop.f32.mrb[36].mxu0 }
 0x7d1   : > { %v2264_v32 = vpop.f32.mrb[37].mxu0  ;;  %v1469_v46 = vsel %vm637_vm3, %v1463_v31, -inf }
 0x7d2   : > { %v1466_v33 = vpop.f32.mrb[38].mxu0 }
 0x7d3   : > { %v2265_v34 = vpop.f32.mrb[39].mxu0 }
 0x7d8   : > { %v1618_v36 = vpop.f32.mrb[40].mxu0 }
 0x7d9   : > { %v2282_v37 = vpop.f32.mrb[41].mxu0  ;;  %v1624_v38 = vsel %vm637_vm3, %v1618_v36, -inf }
 0x7da   : > { %1625 = vmax.xlane.f32.xlu0 %v1624_v38  ;;  %v1621_v39 = vpop.f32.mrb[42].mxu0 }
 0x7db   : > { %v2283_v40 = vpop.f32.mrb[43].mxu0 }
 0x7de   : > { %1164 = vadd.xlane.f32.xlu0 %v1163_v41 }
 0x7df   : > { %v1209_v42 = vpop.f32.mrb[16].mxu1 }
 0x7e0   : > { %v2234_v43 = vpop.f32.mrb[17].mxu1 }
 0x7e1   : > { %v1212_v45 = vpop.f32.mrb[18].mxu1 }
 0x7e2   : > { %v2235_v47 = vpop.f32.mrb[19].mxu1  ;;  %1470 = vmax.xlane.f32.xlu0 %v1469_v46 }
 0x7f8   : > { %1479 = vrot.lane.b32.xlu0 %v3081_v35, %s2659_s26  ;;  %s2662_s26 = smov [#allocation10]  }
 0x7f9   : > { %s2577_s9 = sshll.u32 %s2662_s26, 4  ;;  %s2578_s9 = int_to_ptr.vmem [resolvable:$false] %s2577_s9 }
 0x7fa   : > { %p2580_p3 = scmp.lt.s32.totalorder %s3213_s19, %s2578_s9 }
 0x867   : > { %v1626_v51 = vpop.xlane.xlu0 %1625 }
 0x868   : > { %v1627_v52 = vsub.f32 %v1618_v36, %v1626_v51 }
 0x86a   : > { %v1628_v53 = vmul.f32 1.442695, %v1627_v52 }
 0x86b   : > { %v1165_v54 = vpop.xlane.xlu0 %1164 }
 0x86c   : > { %2439 = vpow2.f32 %v1628_v53 }
 0x86d   : > { %2441 = vrcp.f32 %v1165_v54 }
 0x86e   : > { %2443 = vrcp.f32 %v1323_v57 }
 0x86f   : > { %v1471_v56 = vpop.xlane.xlu0 %1470 }
 0x870   : > { %v1472_v60 = vsub.f32 %v1463_v31, %v1471_v56 }
 0x872   : > { %v1473_v61 = vmul.f32 1.442695, %v1472_v60 }
 0x873   : > { %v1480_v9 = vpop.permute.xlu0 %1479 }
 0x874   : > { %2445 = vpow2.f32 %v1473_v61  ;;  %v1485_v11 = vsel %vm641_vm2, %v1480_v9, 0 }
 0x876   : > { %v2440_v62 = vpop.eup %2439 }
 0x877   : > { %v2442_v63 = vpop.eup %2441  ;;  %v1630_v1 = vsel %vm637_vm3, %v2440_v62, 0.0  ;;  %v1633_v2 = vpack.c.bf16 %v2440_v62, %v2440_v62 }
 0x878   : > { %v1216_v3 = vmul.f32 %v2442_v63, %v1209_v42  ;;  %1631 = vadd.xlane.f32.xlu1 %v1630_v1  ;;  %v2444_v6 = vpop.eup %2443 }
 0x879   : > { %2287 = vmatmul.mubr.msk.bf16.vlgmr.msra.gmra.mrb[44].mxu0 %vm637_vm3, %v1633_v2  ;;  %v1373_v7 = vmul.f32 %v2444_v6, %v1366_v27 }
 0x87a   : > { %2297 = vmatpush3.bf16.msra.mxu0 %v1737_v4  ;;  %v1217_v5 = vpack.c.bf16 %v1216_v3, %v1216_v3  ;;  %2298 = vmatprep.mubr.msk.bf16.mxu0 %vm2656_vm0, %v2655_v0 }
 0x87b   : > { %v1374_v10 = vpack.c.bf16 %v1373_v7, %v1373_v7 }
 0x87c   : > { %2239 = vmatmul.mubr.msk.bf16.vlgmr.msra.gmra.mrb[8].mxu1 %vm637_vm3, %v1217_v5 }
 0x87d   : > { %2255 = vmatpush3.bf16.msra.mxu1 %v3050_v59  ;;  %2256 = vmatprep.mubr.msk.bf16.mxu1 %vm2656_vm0, %v2655_v0 }
 0x87e   : > { %v2446_v44 = vpop.eup %2445  ;;  %2266 = vmatprep.subr.bf16.mxu1 %v2655_v0 }
 0x87f   : > { %v1475_v8 = vsel %vm637_vm3, %v2446_v44, 0.0  ;;  %v1478_v59 = vpack.c.bf16 %v2446_v44, %v2446_v44 }
 0x880   : > { %1476 = vadd.xlane.f32.xlu0 %v1475_v8 }
 0x881   : > { %2299 = vmatmul.mubr.msk.bf16.vlgmr.msra.gmra.mrb[48].mxu0 %vm637_vm3, %v1730_v55 }
 0x884   : > { %2257 = vmatmul.mubr.msk.bf16.vlgmr.msra.gmra.mrb[20].mxu1 %vm637_vm3, %v1374_v10 }
 0x885   : > { %2267 = vmatpush3.bf16.msra.mxu1 %v1485_v11  ;;  %2268 = vmatprep.mubr.msk.bf16.mxu1 %vm2656_vm0, %v2655_v0 }
 0x886   : > { %2272 = vmatprep.subr.bf16.mxu1 %v2655_v0 }
 0x88c   : > { %2269 = vmatmul.mubr.msk.bf16.vlgmr.msra.gmra.mrb[24].mxu1 %vm637_vm3, %v1478_v59 }
 0x88d   : > { %2273 = vmatpush3.bf16.msra.mxu1 %v3106_v58  ;;  %2274 = vmatprep.mubr.msk.bf16.mxu1 %vm2656_vm0, %v2655_v0 }
 0x88e   : > { %2290 = vmatprep.subr.bf16.mxu1 %v2655_v0 }
 0x905   : > { %v1632_v28 = vpop.xlane.xlu1 %1631 }
 0x90d   : > { %v1477_v21 = vpop.xlane.xlu0 %1476 }
 0x90e   : > { %2447 = vrcp.f32 %v1477_v21 }
 0x90f   : > { %2449 = vrcp.f32 %v1632_v28 }
 0x918   : > { %v2448_v29 = vpop.eup %2447 }
 0x919   : > { %v2450_v37 = vpop.eup %2449 }
 0x94c   : > { %v1676_v12 = vpop.f32.mrb[44].mxu0 }
 0x94d   : > { %v2288_v13 = vpop.f32.mrb[45].mxu0  ;;  %v1683_v38 = vmul.f32 %v2450_v37, %v1676_v12 }
 0x94e   : > { %v1679_v16 = vpop.f32.mrb[46].mxu0 }
 0x94f   : > { %v1258_v17 = vpop.f32.mrb[8].mxu1  ;;  %v2289_v18 = vpop.f32.mrb[47].mxu0  ;;  %v1684_v39 = vpack.c.bf16 %v1683_v38, %v1683_v38 }
 0x950   : > { %v2314_v19 = vadd.f32 %v3185_v14, %v1258_v17  ;;  %v2240_v20 = vpop.f32.mrb[9].mxu1 }
 0x951   : > { %v1261_v58 = vpop.f32.mrb[10].mxu1 }
 0x952   : > { %1265 = vst.msk [vmem:[%s3188_s8] sm:$0xff] %vm433_vm1, %v2314_v19  ;;  %v2241_v22 = vpop.f32.mrb[11].mxu1 }
 0x954   : > { %v1773_v23 = vpop.f32.mrb[48].mxu0 }
 0x955   : > { %v2300_v24 = vpop.f32.mrb[49].mxu0  ;;  %v1779_v25 = vsel %vm637_vm3, %v1773_v23, -inf }
 0x956   : > { %1780 = vmax.xlane.f32.xlu1 %v1779_v25  ;;  %v1776_v26 = vpop.f32.mrb[50].mxu0 }
 0x957   : > { %v2301_v27 = vpop.f32.mrb[51].mxu0 }
 0x95f   : > { %v1521_v30 = vpop.f32.mrb[24].mxu1 }
 0x960   : > { %v1528_v31 = vmul.f32 %v2448_v29, %v1521_v30  ;;  %v2270_v32 = vpop.f32.mrb[25].mxu1 }
 0x961   : > { %v1524_v33 = vpop.f32.mrb[26].mxu1 }
 0x962   : > { %v1529_v34 = vpack.c.bf16 %v1528_v31, %v1528_v31  ;;  %v2271_v36 = vpop.f32.mrb[27].mxu1 }
 0x964   : > { %2275 = vmatmul.mubr.msk.bf16.vlgmr.msra.gmra.mrb[20].mxu1 %vm637_vm3, %v1529_v34 }
 0x965   : > { %2291 = vmatpush3.bf16.msra.mxu1 %v3119_v15  ;;  %2292 = vmatprep.mubr.msk.bf16.mxu1 %vm2656_vm0, %v2655_v0 }
 0x966   : > { %2302 = vmatprep.subr.bf16.mxu1 %v2655_v0 }
 0x967   : > { %1789 = vrot.lane.b32.xlu1 %v3081_v35, %s2661_s11  ;;  %s2579_s11 = scalar_lea.vmem %s2578_s9, 512 }
 0x968   : > { %p2581_p9 = scmp.lt.s32.totalorder %s2579_s11, %s2573_s29 }
 0x96a   : > { %p2582_p6 = por %p2581_p9, %p2580_p3 }
 0x96c   : > { %p2583_p4 = pnand %p2582_p6, %p2576_p13 }
 0x970   : > { %2293 = vmatmul.mubr.msk.bf16.vlgmr.msra.gmra.mrb[20].mxu1 %vm637_vm3, %v1684_v39 }
 0x971   : > { %2304 = vmatprep.mubr.msk.bf16.mxu1 %vm2656_vm0, %v2655_v0 }
 0x9e3   : > { %v1781_v40 = vpop.xlane.xlu1 %1780 }
 0x9e4   : > { %v1782_v41 = vsub.f32 %v1773_v23, %v1781_v40 }
 0x9e6   : > { %v1783_v42 = vmul.f32 1.442695, %v1782_v41 }
 0x9e7   : > { %v1790_v15 = vpop.permute.xlu1 %1789 }
 0x9e8   : > { %2451 = vpow2.f32 %v1783_v42  ;;  %v1795_v43 = vsel %vm641_vm2, %v1790_v15, 0 }
 0x9e9   : > { %2303 = vmatpush3.bf16.msra.mxu1 %v1795_v43 }
 0x9ea   : > { %2308 = vmatprep.subr.bf16.mxu1 %v2655_v0 }
 0x9f2   : > { %v2452_v45 = vpop.eup %2451 }
 0x9f3   : > { %v1785_v35 = vsel %vm637_vm3, %v2452_v45, 0.0  ;;  %v1788_v46 = vpack.c.bf16 %v2452_v45, %v2452_v45 }
 0x9f4   : > { %1786 = vadd.xlane.f32.xlu0 %v1785_v35 }
 0x9f5   : > { %2305 = vmatmul.mubr.msk.bf16.vlgmr.msra.gmra.mrb[28].mxu1 %vm637_vm3, %v1788_v46 }
 0x9f6   : > { %2309 = vmatpush3.bf16.msra.mxu1 %v3155_v49  ;;  %2310 = vmatprep.mubr.msk.bf16.mxu1 %vm2656_vm0, %v2655_v0 }
 0xa81   : > { %v1787_v47 = vpop.xlane.xlu0 %1786 }
 0xa82   : > { %2453 = vrcp.f32 %v1787_v47 }
 0xa8c   : > { %v2454_v48 = vpop.eup %2453 }
 0xac8   : > { %v1831_v50 = vpop.f32.mrb[28].mxu1 }
 0xac9   : > { %v1838_v51 = vmul.f32 %v2454_v48, %v1831_v50  ;;  %v2306_v52 = vpop.f32.mrb[29].mxu1 }
 0xaca   : > { %v1834_v53 = vpop.f32.mrb[30].mxu1 }
 0xacb   : > { %v1839_v54 = vpack.c.bf16 %v1838_v51, %v1838_v51  ;;  %v2307_v55 = vpop.f32.mrb[31].mxu1 }
 0xacd   : > { %2311 = vmatmul.mubr.msk.bf16.vlgmr.msra.gmra.mrb[20].mxu1 %vm637_vm3, %v1839_v54 }
 0xba0   : > { %v1877_v0 = vpop.f32.mrb[20].mxu1 }
 0xba1   : > { %v2315_v49 = vadd.f32 %v3185_v14, %v1877_v0  ;;  %v2312_v56 = vpop.f32.mrb[21].mxu1 }
 0xba2   : > { %v1880_v57 = vpop.f32.mrb[22].mxu1 }
 0xba3   : > { %2079 = vst.msk [vmem:[%s3188_s8 + $0x8] sm:$0xff] %vm433_vm1, %v2315_v49  ;;  %v2313_v60 = vpop.f32.mrb[23].mxu1 }
 0xba4   : > { %2586 = shalt.err (!%p2583_p4)
}
 0xba5   : > { %s2587_s1 = scalar_lea.hbm %s3218_s7, 256  ;;  %s2591_s23 = scalar_lea.hbm %s3327_s28, 512 }
 0xba6   : > { %p2588_p7 = scmp.ne.s32.totalorder %s3218_s7, %s2587_s1  ;;  %p2592_p11 = scmp.lt.u32.totalorder %s3218_s7, %s3327_s28 }
 0xba7   : > { %p2593_p0 = scmp.lt.u32.totalorder %s2591_s23, %s2587_s1  ;;  %p2595_p2 = scmp.lt.u32.totalorder %s2587_s1, %s3218_s7 }
 0xba8   : > { %p2589_p5 = pnand %p2588_p7, %p3328_p12 }
 0xba9   : > { %p2594_p1 = por %p2593_p0, %p2592_p11 }
 0xbaa   : > { %p2590_p8 = pneg %p2589_p5 }
 0xbab   : > { %p2596_p10 = por %p2595_p2, %p2594_p1 }
 0xbad   : > { %p2597_p13 = pnand %p2596_p10, %p2590_p8 }
 0xbaf   : > { %2600 = shalt.err (!%p2597_p13)
}
 0xbb0   : > { %s2663_s17 = smov 128   ;;  %s2664_s15 = smov 8  }
 0xbb1   : > { %2350 = dma.vmem_to_hbm [thread:$0]  (%p3328_p12), %s3213_s19, 256, %s3218_s7, %s1887_s24, %s2663_s17, %s2663_s17, %s2664_s15  }
 0xbb2 PF: > { %s3329_s30 = sld [smem:[#allocation15_spill]]  ;;  %s3330_s18 = sld [smem:[#allocation21_spill]] }
 0xbb3   : > { %s3331_s12 = sld [smem:[#allocation17_spill]] }
 0xbb8   : > { %s1915_s8 = sand.u32 1, %s3329_s30   ;;  %p3332_p3 = scmp.ne.s32.totalorder %s3330_s18, 0 }
 0xbb9   : > { %p3333_p9 = scmp.ge.s32.totalorder %s3331_s12, 2  ;;  %s1916_s13 = scalar_lea.sflag [#allocation4], %s1915_s8 }
 0xbbb   : > { %p2367_p6 = pnand %p3333_p9, %p3332_p3 }
 0xbbd   : > { %2630 = dma.done.wait (!%p2367_p6), %s1916_s13, 256  }
 0xbbe   : > { %2632 = vsyncadd (!%p2367_p6), %s1916_s13, 4294967040  ;;  %s3334_s27 = sld [smem:[#allocation18_spill]]  ;;  %s3335_s14 = sld [smem:[#allocation16_spill]] }
 0xbbf   : > { %s3336_s26 = sld [smem:[#allocation19_spill]]  ;;  %s3337_s24 = smov %s2639_s25 }
 0xbc4   : > { %p24_p4 = scmp.ge.s32.totalorder %s3334_s27, 4   ;;  %s3338_s25 = smov %s3335_s14 }
 0xbc6   :  { %26 = sbr.rel (!%p24_p4) target bundleno = 12 (0xc), region = 122 }
 0xbcd   :  { %1921 = vsyncpa [#allocation3], 1 }
 0xbce   :  { %1923 = vsyncpa [#allocation3 + $0x1], 1 }
 0xbcf   :  { %1924 = vsyncpa [#allocation6], 1 }
 0xbd0   :  { %1926 = vsyncpa [#allocation6 + $0x1], 1 }
 0xbd1   :  { %1927 = vsyncpa [#allocation9], 1 }
 0xbd2   :  { %1928 = vsyncpa [#allocation4], 1 }
 0xbd3   :  { %1930 = vsyncpa [#allocation4 + $0x1], 1 }

</bundles_post_ra>
